<compile_context>
chip_gen: v6e
topology: v6e:2x2x1
jax: 0.10.0
libtpu: 0.0.40
codegen_flags: <defaults>
</compile_context>

<pallas_src>
import functools
import math

import jax
import jax.numpy as jnp
from jax import lax
from jax.experimental import pallas as pl
from jax.experimental.pallas import tpu as pltpu


# --------------------------- fused LSTM + FC kernel ---------------------------

def _fused_lstm_fc_kernel(num_layers, hidden_dim, x_ref, *refs):
    """Single-invocation kernel: all LSTM layers over the full sequence, then FC.

    x_ref      : (B, T, D)  batch-first input (full array in VMEM)
    per layer  : w_ih (in, 4H), w_hh (H, 4H), b (1, 4H)   [gate order i, f, o, g]
    w_fc, b_fc : (H, O), (1, O)
    out_ref    : (B, O)
    gx_scr     : (T, B, 4H) VMEM scratch -- hoisted input-projection gates
    seq_scr    : (T, B, H)  VMEM scratch -- hidden sequence fed to the next layer
    """
    H = hidden_dim
    n_lw = 3 * num_layers
    layer_refs = refs[:n_lw]
    w_fc_ref = refs[n_lw]
    b_fc_ref = refs[n_lw + 1]
    out_ref = refs[n_lw + 2]
    gx_scr = refs[n_lw + 3]
    seq_scr = refs[n_lw + 4]

    B, T, D = x_ref.shape

    h_last = None
    for layer in range(num_layers):
        w_ih = layer_refs[3 * layer][...]       # (in_dim, 4H)
        w_hh = layer_refs[3 * layer + 1][...]   # (H, 4H)
        b = layer_refs[3 * layer + 2][...]      # (1, 4H)

        # ---- hoisted input projection: one MXU matmul for all timesteps ----
        if layer == 0:
            # Re-layout the (small, D-lane-wide) input once; the 4H-wide gate
            # projection is then produced directly in (T, B, 4H) layout.
            xin = jnp.transpose(x_ref[...], (1, 0, 2))              # (T, B, D)
            gx_scr[...] = (jnp.dot(xin.reshape(T * B, D), w_ih,
                                   preferred_element_type=jnp.float32)
                           + b).reshape(T, B, 4 * H)
        else:
            hin = seq_scr[...]                                      # (T, B, H)
            gx_scr[...] = (jnp.dot(hin.reshape(T * B, H), w_ih,
                                   preferred_element_type=jnp.float32)
                           + b).reshape(T, B, 4 * H)

        write_seq = layer < num_layers - 1  # last layer only needs h at t = T-1

        # ---- serial recurrence: only h_prev @ W_hh + gate math per step ----
        def step(t, carry, w_hh=w_hh, write_seq=write_seq):
            h_prev, c_prev = carry
            gates = gx_scr[t] + jnp.dot(h_prev, w_hh,
                                        preferred_element_type=jnp.float32)  # (B, 4H)
            # gate packing: [i | f | o | g] -> one sigmoid slab + one tanh slab
            s = jax.nn.sigmoid(gates[:, :3 * H])
            i_g = s[:, 0 * H:1 * H]
            f_g = s[:, 1 * H:2 * H]
            o_g = s[:, 2 * H:3 * H]
            g_g = jnp.tanh(gates[:, 3 * H:4 * H])
            c_new = f_g * c_prev + i_g * g_g
            h_new = o_g * jnp.tanh(c_new)
            if write_seq:
                seq_scr[t] = h_new
            return (h_new, c_new)

        zeros = jnp.zeros((B, H), jnp.float32)
        h_last, _ = lax.fori_loop(0, T, step, (zeros, zeros), unroll=True)

    # ---- fused FC on the last hidden state (== out[:, -1, :] @ W_fc + b) ----
    out_ref[...] = (jnp.dot(h_last, w_fc_ref[...],
                            preferred_element_type=jnp.float32) + b_fc_ref[...])


def lstm_feature_extractor_forward_pallas(x_btd, params):
    """x_btd: (B, T, D) batch-first (like the PyTorch module). Returns (B, O)."""
    B, T, D = x_btd.shape
    num_layers = len(params["layers"])
    H = params["layers"][0]["w_hh"].shape[0]
    O = params["w_fc"].shape[1]

    kernel = functools.partial(_fused_lstm_fc_kernel, num_layers, H)

    in_specs = [pl.BlockSpec((B, T, D), lambda i: (0, 0, 0))]
    args = [x_btd]
    for lp in params["layers"]:
        in_dim = lp["w_ih"].shape[0]
        in_specs += [
            pl.BlockSpec((in_dim, 4 * H), lambda i: (0, 0)),
            pl.BlockSpec((H, 4 * H), lambda i: (0, 0)),
            pl.BlockSpec((1, 4 * H), lambda i: (0, 0)),
        ]
        args += [lp["w_ih"], lp["w_hh"], lp["b"]]
    in_specs += [
        pl.BlockSpec((H, O), lambda i: (0, 0)),
        pl.BlockSpec((1, O), lambda i: (0, 0)),
    ]
    args += [params["w_fc"], params["b_fc"]]

    return pl.pallas_call(
        kernel,
        out_shape=jax.ShapeDtypeStruct((B, O), jnp.float32),
        grid_spec=pltpu.PrefetchScalarGridSpec(
            num_scalar_prefetch=0,
            grid=(1,),
            in_specs=in_specs,
            out_specs=pl.BlockSpec((B, O), lambda i: (0, 0)),
            scratch_shapes=[
                pltpu.VMEM((T, B, 4 * H), jnp.float32),  # hoisted gate projections
                pltpu.VMEM((T, B, H), jnp.float32),      # inter-layer hidden sequence
            ],
        ),
        compiler_params=pltpu.CompilerParams(
            dimension_semantics=("arbitrary",),
        ),
    )(*args)


@jax.jit
def lstm_feature_extractor_forward(x_btd, params):
    return lstm_feature_extractor_forward_pallas(x_btd, params)


# ------------------------------ parameter init --------------------------------

def init_params(key, input_dim, hidden_dim, num_layers, output_dim):
    """Deterministic init mimicking PyTorch's U(-1/sqrt(H), 1/sqrt(H)).

    Weights are stored transposed relative to PyTorch ((in, 4H) / (H, 4H)) and
    gate-packed as (i, f, o, g) -- a pure storage-layout choice (weights are
    freshly initialized); the LSTM math is identical to nn.LSTM's forward.
    """
    params = {"layers": []}
    bound = 1.0 / math.sqrt(hidden_dim)
    in_dim = input_dim
    for _ in range(num_layers):
        key, k1, k2, k3, k4 = jax.random.split(key, 5)
        w_ih = jax.random.uniform(k1, (in_dim, 4 * hidden_dim), jnp.float32, -bound, bound)
        w_hh = jax.random.uniform(k2, (hidden_dim, 4 * hidden_dim), jnp.float32, -bound, bound)
        b_ih = jax.random.uniform(k3, (4 * hidden_dim,), jnp.float32, -bound, bound)
        b_hh = jax.random.uniform(k4, (4 * hidden_dim,), jnp.float32, -bound, bound)
        params["layers"].append(
            {"w_ih": w_ih, "w_hh": w_hh, "b": (b_ih + b_hh)[None, :]}
        )
        in_dim = hidden_dim
    fc_bound = 1.0 / math.sqrt(hidden_dim)
    key, k1, k2 = jax.random.split(key, 3)
    params["w_fc"] = jax.random.uniform(
        k1, (hidden_dim, output_dim), jnp.float32, -fc_bound, fc_bound)
    params["b_fc"] = jax.random.uniform(
        k2, (1, output_dim), jnp.float32, -fc_bound, fc_bound)
    return params


# ------------------------------ pure-JAX reference ------------------------------

def _reference_forward(x_btd, params):
    h = jnp.transpose(x_btd, (1, 0, 2))  # (T, B, D)
    for lp in params["layers"]:
        H = lp["w_hh"].shape[0]
        B = h.shape[1]

        def step(carry, x_t, lp=lp, H=H):
            h_prev, c_prev = carry
            gates = x_t @ lp["w_ih"] + h_prev @ lp["w_hh"] + lp["b"]
            # gate packing (i, f, o, g)
            i = jax.nn.sigmoid(gates[:, 0 * H:1 * H])
            f = jax.nn.sigmoid(gates[:, 1 * H:2 * H])
            o = jax.nn.sigmoid(gates[:, 2 * H:3 * H])
            g = jnp.tanh(gates[:, 3 * H:4 * H])
            c = f * c_prev + i * g
            hn = o * jnp.tanh(c)
            return (hn, c), hn

        init = (jnp.zeros((B, H), jnp.float32), jnp.zeros((B, H), jnp.float32))
        _, h = lax.scan(step, init, h)
    return h[-1] @ params["w_fc"] + params["b_fc"]


# ------------------------------------ main -------------------------------------

if __name__ == "__main__":
    B, T, D = 2, 8, 16          # batch, seq, input_dim
    H, O = 32, 8                # hidden_dim, output_dim
    NUM_LAYERS = 2

    key = jax.random.PRNGKey(0)
    key, kx, kp = jax.random.split(key, 3)
    x = jax.random.normal(kx, (B, T, D), jnp.float32)
    params = init_params(kp, D, H, NUM_LAYERS, O)

    # TODO(synk): bidirectional=True variant (reverse-direction pass + concat) not
    # implemented; the module's default bidirectional=False path is covered.
    out = lstm_feature_extractor_forward(x, params)
    out = jax.block_until_ready(out)

    ref = _reference_forward(x, params)
    assert out.shape == (B, O)
    assert jnp.allclose(out, ref, atol=1e-4, rtol=1e-4), "mismatch vs pure-JAX reference"

    print("KERNEL_OK")
</pallas_src>

<mosaic_0001>
module attributes {stable_mosaic.version = 11 : i64} {
  func.func @_fused_lstm_fc_kernel(%arg0: i32, %arg1: memref<2x8x16xf32, #tpu.memory_space<vmem>>, %arg2: memref<16x128xf32, #tpu.memory_space<vmem>>, %arg3: memref<32x128xf32, #tpu.memory_space<vmem>>, %arg4: memref<1x128xf32, #tpu.memory_space<vmem>>, %arg5: memref<32x128xf32, #tpu.memory_space<vmem>>, %arg6: memref<32x128xf32, #tpu.memory_space<vmem>>, %arg7: memref<1x128xf32, #tpu.memory_space<vmem>>, %arg8: memref<32x8xf32, #tpu.memory_space<vmem>>, %arg9: memref<1x8xf32, #tpu.memory_space<vmem>>, %arg10: memref<2x8xf32, #tpu.memory_space<vmem>>, %arg11: memref<8x2x128xf32, #tpu.memory_space<vmem>>, %arg12: memref<8x2x32xf32, #tpu.memory_space<vmem>>) attributes {dimension_semantics = [#tpu.dimension_semantics<arbitrary>], iteration_bounds = array<i64: 1>, scalar_prefetch = 0 : i64, scratch_operands = 2 : i64, tpu.core_type = #tpu.core_type<tc>, window_params = [{pipeline_mode = #tpu.pipeline_mode<synchronous>, transform_indices = @transform_0, window_bounds = array<i64: 2, 8, 16>}, {pipeline_mode = #tpu.pipeline_mode<synchronous>, transform_indices = @transform_1, window_bounds = array<i64: 16, 128>}, {pipeline_mode = #tpu.pipeline_mode<synchronous>, transform_indices = @transform_2, window_bounds = array<i64: 32, 128>}, {pipeline_mode = #tpu.pipeline_mode<synchronous>, transform_indices = @transform_3, window_bounds = array<i64: 1, 128>}, {pipeline_mode = #tpu.pipeline_mode<synchronous>, transform_indices = @transform_4, window_bounds = array<i64: 32, 128>}, {pipeline_mode = #tpu.pipeline_mode<synchronous>, transform_indices = @transform_5, window_bounds = array<i64: 32, 128>}, {pipeline_mode = #tpu.pipeline_mode<synchronous>, transform_indices = @transform_6, window_bounds = array<i64: 1, 128>}, {pipeline_mode = #tpu.pipeline_mode<synchronous>, transform_indices = @transform_7, window_bounds = array<i64: 32, 8>}, {pipeline_mode = #tpu.pipeline_mode<synchronous>, transform_indices = @transform_8, window_bounds = array<i64: 1, 8>}, {pipeline_mode = #tpu.pipeline_mode<synchronous>, transform_indices = @transform_9, window_bounds = array<i64: 2, 8>}]} {
    %c0 = arith.constant 0 : index
    %c0_0 = arith.constant 0 : index
    %0 = vector.load %arg2[%c0, %c0_0] : memref<16x128xf32, #tpu.memory_space<vmem>>, vector<16x128xf32>
    %c0_1 = arith.constant 0 : index
    %c0_2 = arith.constant 0 : index
    %1 = vector.load %arg3[%c0_1, %c0_2] : memref<32x128xf32, #tpu.memory_space<vmem>>, vector<32x128xf32>
    %c0_3 = arith.constant 0 : index
    %c0_4 = arith.constant 0 : index
    %2 = vector.load %arg4[%c0_3, %c0_4] : memref<1x128xf32, #tpu.memory_space<vmem>>, vector<1x128xf32>
    %c0_5 = arith.constant 0 : index
    %c0_6 = arith.constant 0 : index
    %c0_7 = arith.constant 0 : index
    %3 = vector.load %arg1[%c0_5, %c0_6, %c0_7] : memref<2x8x16xf32, #tpu.memory_space<vmem>>, vector<2x8x16xf32>
    %4 = tpu.transpose %3, [1, 0, 2] : vector<2x8x16xf32> -> vector<8x2x16xf32>
    %5 = vector.shape_cast %4 : vector<8x2x16xf32> to vector<16x16xf32>
    %cst = arith.constant dense<0.000000e+00> : vector<16x128xf32>
    %6 = tpu.matmul %5, %0, %cst {dimension_numbers = #tpu.dot_dimension_numbers<[1], [0], [0], [1], [0, 0, 1, 1], [], []>} : vector<16x16xf32>, vector<16x128xf32>, vector<16x128xf32> -> vector<16x128xf32>
    %7 = vector.broadcast %2 : vector<1x128xf32> to vector<16x128xf32>
    %8 = arith.addf %6, %7 : vector<16x128xf32>
    %9 = vector.shape_cast %8 : vector<16x128xf32> to vector<8x2x128xf32>
    %c0_8 = arith.constant 0 : index
    %c0_9 = arith.constant 0 : index
    %c0_10 = arith.constant 0 : index
    %10 = vector.load %arg11[%c0_8, %c0_9, %c0_10] : memref<8x2x128xf32, #tpu.memory_space<vmem>>, vector<8x2x128xf32>
    tpu.vector_store %arg11[%c0_8, %c0_9, %c0_10], %9 {strides = array<i32>} : memref<8x2x128xf32, #tpu.memory_space<vmem>>, vector<8x2x128xf32>,
    %cst_11 = arith.constant 0.000000e+00 : f32
    %11 = vector.broadcast %cst_11 : f32 to vector<2x32xf32>
    %c0_i32 = arith.constant 0 : i32
    %12 = arith.index_cast %c0_i32 : i32 to index
    %c0_12 = arith.constant 0 : index
    %c0_13 = arith.constant 0 : index
    %13 = vector.load %arg11[%12, %c0_12, %c0_13] : memref<8x2x128xf32, #tpu.memory_space<vmem>>, vector<1x2x128xf32>
    %14 = vector.shape_cast %13 : vector<1x2x128xf32> to vector<2x128xf32>
    %cst_14 = arith.constant dense<0.000000e+00> : vector<2x128xf32>
    %15 = tpu.matmul %11, %1, %cst_14 {dimension_numbers = #tpu.dot_dimension_numbers<[1], [0], [0], [1], [0, 0, 1, 1], [], []>} : vector<2x32xf32>, vector<32x128xf32>, vector<2x128xf32> -> vector<2x128xf32>
    %16 = arith.addf %14, %15 : vector<2x128xf32>
    %17 = vector.extract_strided_slice %16 {offsets = [0, 0], sizes = [2, 96], strides = [1, 1]} : vector<2x128xf32> to vector<2x96xf32>
    %18 = arith.negf %17 : vector<2x96xf32>
    %19 = math.exp %18 : vector<2x96xf32>
    %cst_15 = arith.constant 1.000000e+00 : f32
    %20 = vector.broadcast %cst_15 : f32 to vector<2x96xf32>
    %21 = arith.addf %20, %19 : vector<2x96xf32>
    %22 = arith.divf %20, %21 : vector<2x96xf32>
    %23 = vector.extract_strided_slice %22 {offsets = [0, 0], sizes = [2, 32], strides = [1, 1]} : vector<2x96xf32> to vector<2x32xf32>
    %24 = vector.extract_strided_slice %22 {offsets = [0, 32], sizes = [2, 32], strides = [1, 1]} : vector<2x96xf32> to vector<2x32xf32>
    %25 = vector.extract_strided_slice %22 {offsets = [0, 64], sizes = [2, 32], strides = [1, 1]} : vector<2x96xf32> to vector<2x32xf32>
    %26 = vector.extract_strided_slice %16 {offsets = [0, 96], sizes = [2, 32], strides = [1, 1]} : vector<2x128xf32> to vector<2x32xf32>
    %27 = math.tanh %26 : vector<2x32xf32>
    %28 = arith.mulf %24, %11 : vector<2x32xf32>
    %29 = arith.mulf %23, %27 : vector<2x32xf32>
    %30 = arith.addf %28, %29 : vector<2x32xf32>
    %31 = math.tanh %30 : vector<2x32xf32>
    %32 = arith.mulf %25, %31 : vector<2x32xf32>
    %33 = arith.index_cast %c0_i32 : i32 to index
    %c0_16 = arith.constant 0 : index
    %c0_17 = arith.constant 0 : index
    %34 = vector.load %arg12[%33, %c0_16, %c0_17] : memref<8x2x32xf32, #tpu.memory_space<vmem>>, vector<1x2x32xf32>
    %35 = vector.shape_cast %34 : vector<1x2x32xf32> to vector<2x32xf32>
    %36 = vector.shape_cast %32 : vector<2x32xf32> to vector<1x2x32xf32>
    tpu.vector_store %arg12[%33, %c0_16, %c0_17], %36 {strides = array<i32>} : memref<8x2x32xf32, #tpu.memory_space<vmem>>, vector<1x2x32xf32>,
    %c1_i32 = arith.constant 1 : i32
    %37 = arith.index_cast %c1_i32 : i32 to index
    %c0_18 = arith.constant 0 : index
    %c0_19 = arith.constant 0 : index
    %38 = vector.load %arg11[%37, %c0_18, %c0_19] : memref<8x2x128xf32, #tpu.memory_space<vmem>>, vector<1x2x128xf32>
    %39 = vector.shape_cast %38 : vector<1x2x128xf32> to vector<2x128xf32>
    %cst_20 = arith.constant dense<0.000000e+00> : vector<2x128xf32>
    %40 = tpu.matmul %32, %1, %cst_20 {dimension_numbers = #tpu.dot_dimension_numbers<[1], [0], [0], [1], [0, 0, 1, 1], [], []>} : vector<2x32xf32>, vector<32x128xf32>, vector<2x128xf32> -> vector<2x128xf32>
    %41 = arith.addf %39, %40 : vector<2x128xf32>
    %42 = vector.extract_strided_slice %41 {offsets = [0, 0], sizes = [2, 96], strides = [1, 1]} : vector<2x128xf32> to vector<2x96xf32>
    %43 = arith.negf %42 : vector<2x96xf32>
    %44 = math.exp %43 : vector<2x96xf32>
    %cst_21 = arith.constant 1.000000e+00 : f32
    %45 = vector.broadcast %cst_21 : f32 to vector<2x96xf32>
    %46 = arith.addf %45, %44 : vector<2x96xf32>
    %47 = arith.divf %45, %46 : vector<2x96xf32>
    %48 = vector.extract_strided_slice %47 {offsets = [0, 0], sizes = [2, 32], strides = [1, 1]} : vector<2x96xf32> to vector<2x32xf32>
    %49 = vector.extract_strided_slice %47 {offsets = [0, 32], sizes = [2, 32], strides = [1, 1]} : vector<2x96xf32> to vector<2x32xf32>
    %50 = vector.extract_strided_slice %47 {offsets = [0, 64], sizes = [2, 32], strides = [1, 1]} : vector<2x96xf32> to vector<2x32xf32>
    %51 = vector.extract_strided_slice %41 {offsets = [0, 96], sizes = [2, 32], strides = [1, 1]} : vector<2x128xf32> to vector<2x32xf32>
    %52 = math.tanh %51 : vector<2x32xf32>
    %53 = arith.mulf %49, %30 : vector<2x32xf32>
    %54 = arith.mulf %48, %52 : vector<2x32xf32>
    %55 = arith.addf %53, %54 : vector<2x32xf32>
    %56 = math.tanh %55 : vector<2x32xf32>
    %57 = arith.mulf %50, %56 : vector<2x32xf32>
    %58 = arith.index_cast %c1_i32 : i32 to index
    %c0_22 = arith.constant 0 : index
    %c0_23 = arith.constant 0 : index
    %59 = vector.load %arg12[%58, %c0_22, %c0_23] : memref<8x2x32xf32, #tpu.memory_space<vmem>>, vector<1x2x32xf32>
    %60 = vector.shape_cast %59 : vector<1x2x32xf32> to vector<2x32xf32>
    %61 = vector.shape_cast %57 : vector<2x32xf32> to vector<1x2x32xf32>
    tpu.vector_store %arg12[%58, %c0_22, %c0_23], %61 {strides = array<i32>} : memref<8x2x32xf32, #tpu.memory_space<vmem>>, vector<1x2x32xf32>,
    %c2_i32 = arith.constant 2 : i32
    %62 = arith.index_cast %c2_i32 : i32 to index
    %c0_24 = arith.constant 0 : index
    %c0_25 = arith.constant 0 : index
    %63 = vector.load %arg11[%62, %c0_24, %c0_25] : memref<8x2x128xf32, #tpu.memory_space<vmem>>, vector<1x2x128xf32>
    %64 = vector.shape_cast %63 : vector<1x2x128xf32> to vector<2x128xf32>
    %cst_26 = arith.constant dense<0.000000e+00> : vector<2x128xf32>
    %65 = tpu.matmul %57, %1, %cst_26 {dimension_numbers = #tpu.dot_dimension_numbers<[1], [0], [0], [1], [0, 0, 1, 1], [], []>} : vector<2x32xf32>, vector<32x128xf32>, vector<2x128xf32> -> vector<2x128xf32>
    %66 = arith.addf %64, %65 : vector<2x128xf32>
    %67 = vector.extract_strided_slice %66 {offsets = [0, 0], sizes = [2, 96], strides = [1, 1]} : vector<2x128xf32> to vector<2x96xf32>
    %68 = arith.negf %67 : vector<2x96xf32>
    %69 = math.exp %68 : vector<2x96xf32>
    %cst_27 = arith.constant 1.000000e+00 : f32
    %70 = vector.broadcast %cst_27 : f32 to vector<2x96xf32>
    %71 = arith.addf %70, %69 : vector<2x96xf32>
    %72 = arith.divf %70, %71 : vector<2x96xf32>
    %73 = vector.extract_strided_slice %72 {offsets = [0, 0], sizes = [2, 32], strides = [1, 1]} : vector<2x96xf32> to vector<2x32xf32>
    %74 = vector.extract_strided_slice %72 {offsets = [0, 32], sizes = [2, 32], strides = [1, 1]} : vector<2x96xf32> to vector<2x32xf32>
    %75 = vector.extract_strided_slice %72 {offsets = [0, 64], sizes = [2, 32], strides = [1, 1]} : vector<2x96xf32> to vector<2x32xf32>
    %76 = vector.extract_strided_slice %66 {offsets = [0, 96], sizes = [2, 32], strides = [1, 1]} : vector<2x128xf32> to vector<2x32xf32>
    %77 = math.tanh %76 : vector<2x32xf32>
    %78 = arith.mulf %74, %55 : vector<2x32xf32>
    %79 = arith.mulf %73, %77 : vector<2x32xf32>
    %80 = arith.addf %78, %79 : vector<2x32xf32>
    %81 = math.tanh %80 : vector<2x32xf32>
    %82 = arith.mulf %75, %81 : vector<2x32xf32>
    %83 = arith.index_cast %c2_i32 : i32 to index
    %c0_28 = arith.constant 0 : index
    %c0_29 = arith.constant 0 : index
    %84 = vector.load %arg12[%83, %c0_28, %c0_29] : memref<8x2x32xf32, #tpu.memory_space<vmem>>, vector<1x2x32xf32>
    %85 = vector.shape_cast %84 : vector<1x2x32xf32> to vector<2x32xf32>
    %86 = vector.shape_cast %82 : vector<2x32xf32> to vector<1x2x32xf32>
    tpu.vector_store %arg12[%83, %c0_28, %c0_29], %86 {strides = array<i32>} : memref<8x2x32xf32, #tpu.memory_space<vmem>>, vector<1x2x32xf32>,
    %c3_i32 = arith.constant 3 : i32
    %87 = arith.index_cast %c3_i32 : i32 to index
    %c0_30 = arith.constant 0 : index
    %c0_31 = arith.constant 0 : index
    %88 = vector.load %arg11[%87, %c0_30, %c0_31] : memref<8x2x128xf32, #tpu.memory_space<vmem>>, vector<1x2x128xf32>
    %89 = vector.shape_cast %88 : vector<1x2x128xf32> to vector<2x128xf32>
    %cst_32 = arith.constant dense<0.000000e+00> : vector<2x128xf32>
    %90 = tpu.matmul %82, %1, %cst_32 {dimension_numbers = #tpu.dot_dimension_numbers<[1], [0], [0], [1], [0, 0, 1, 1], [], []>} : vector<2x32xf32>, vector<32x128xf32>, vector<2x128xf32> -> vector<2x128xf32>
    %91 = arith.addf %89, %90 : vector<2x128xf32>
    %92 = vector.extract_strided_slice %91 {offsets = [0, 0], sizes = [2, 96], strides = [1, 1]} : vector<2x128xf32> to vector<2x96xf32>
    %93 = arith.negf %92 : vector<2x96xf32>
    %94 = math.exp %93 : vector<2x96xf32>
    %cst_33 = arith.constant 1.000000e+00 : f32
    %95 = vector.broadcast %cst_33 : f32 to vector<2x96xf32>
    %96 = arith.addf %95, %94 : vector<2x96xf32>
    %97 = arith.divf %95, %96 : vector<2x96xf32>
    %98 = vector.extract_strided_slice %97 {offsets = [0, 0], sizes = [2, 32], strides = [1, 1]} : vector<2x96xf32> to vector<2x32xf32>
    %99 = vector.extract_strided_slice %97 {offsets = [0, 32], sizes = [2, 32], strides = [1, 1]} : vector<2x96xf32> to vector<2x32xf32>
    %100 = vector.extract_strided_slice %97 {offsets = [0, 64], sizes = [2, 32], strides = [1, 1]} : vector<2x96xf32> to vector<2x32xf32>
    %101 = vector.extract_strided_slice %91 {offsets = [0, 96], sizes = [2, 32], strides = [1, 1]} : vector<2x128xf32> to vector<2x32xf32>
    %102 = math.tanh %101 : vector<2x32xf32>
    %103 = arith.mulf %99, %80 : vector<2x32xf32>
    %104 = arith.mulf %98, %102 : vector<2x32xf32>
    %105 = arith.addf %103, %104 : vector<2x32xf32>
    %106 = math.tanh %105 : vector<2x32xf32>
    %107 = arith.mulf %100, %106 : vector<2x32xf32>
    %108 = arith.index_cast %c3_i32 : i32 to index
    %c0_34 = arith.constant 0 : index
    %c0_35 = arith.constant 0 : index
    %109 = vector.load %arg12[%108, %c0_34, %c0_35] : memref<8x2x32xf32, #tpu.memory_space<vmem>>, vector<1x2x32xf32>
    %110 = vector.shape_cast %109 : vector<1x2x32xf32> to vector<2x32xf32>
    %111 = vector.shape_cast %107 : vector<2x32xf32> to vector<1x2x32xf32>
    tpu.vector_store %arg12[%108, %c0_34, %c0_35], %111 {strides = array<i32>} : memref<8x2x32xf32, #tpu.memory_space<vmem>>, vector<1x2x32xf32>,
    %c4_i32 = arith.constant 4 : i32
    %112 = arith.index_cast %c4_i32 : i32 to index
    %c0_36 = arith.constant 0 : index
    %c0_37 = arith.constant 0 : index
    %113 = vector.load %arg11[%112, %c0_36, %c0_37] : memref<8x2x128xf32, #tpu.memory_space<vmem>>, vector<1x2x128xf32>
    %114 = vector.shape_cast %113 : vector<1x2x128xf32> to vector<2x128xf32>
    %cst_38 = arith.constant dense<0.000000e+00> : vector<2x128xf32>
    %115 = tpu.matmul %107, %1, %cst_38 {dimension_numbers = #tpu.dot_dimension_numbers<[1], [0], [0], [1], [0, 0, 1, 1], [], []>} : vector<2x32xf32>, vector<32x128xf32>, vector<2x128xf32> -> vector<2x128xf32>
    %116 = arith.addf %114, %115 : vector<2x128xf32>
    %117 = vector.extract_strided_slice %116 {offsets = [0, 0], sizes = [2, 96], strides = [1, 1]} : vector<2x128xf32> to vector<2x96xf32>
    %118 = arith.negf %117 : vector<2x96xf32>
    %119 = math.exp %118 : vector<2x96xf32>
    %cst_39 = arith.constant 1.000000e+00 : f32
    %120 = vector.broadcast %cst_39 : f32 to vector<2x96xf32>
    %121 = arith.addf %120, %119 : vector<2x96xf32>
    %122 = arith.divf %120, %121 : vector<2x96xf32>
    %123 = vector.extract_strided_slice %122 {offsets = [0, 0], sizes = [2, 32], strides = [1, 1]} : vector<2x96xf32> to vector<2x32xf32>
    %124 = vector.extract_strided_slice %122 {offsets = [0, 32], sizes = [2, 32], strides = [1, 1]} : vector<2x96xf32> to vector<2x32xf32>
    %125 = vector.extract_strided_slice %122 {offsets = [0, 64], sizes = [2, 32], strides = [1, 1]} : vector<2x96xf32> to vector<2x32xf32>
    %126 = vector.extract_strided_slice %116 {offsets = [0, 96], sizes = [2, 32], strides = [1, 1]} : vector<2x128xf32> to vector<2x32xf32>
    %127 = math.tanh %126 : vector<2x32xf32>
    %128 = arith.mulf %124, %105 : vector<2x32xf32>
    %129 = arith.mulf %123, %127 : vector<2x32xf32>
    %130 = arith.addf %128, %129 : vector<2x32xf32>
    %131 = math.tanh %130 : vector<2x32xf32>
    %132 = arith.mulf %125, %131 : vector<2x32xf32>
    %133 = arith.index_cast %c4_i32 : i32 to index
    %c0_40 = arith.constant 0 : index
    %c0_41 = arith.constant 0 : index
    %134 = vector.load %arg12[%133, %c0_40, %c0_41] : memref<8x2x32xf32, #tpu.memory_space<vmem>>, vector<1x2x32xf32>
    %135 = vector.shape_cast %134 : vector<1x2x32xf32> to vector<2x32xf32>
    %136 = vector.shape_cast %132 : vector<2x32xf32> to vector<1x2x32xf32>
    tpu.vector_store %arg12[%133, %c0_40, %c0_41], %136 {strides = array<i32>} : memref<8x2x32xf32, #tpu.memory_space<vmem>>, vector<1x2x32xf32>,
    %c5_i32 = arith.constant 5 : i32
    %137 = arith.index_cast %c5_i32 : i32 to index
    %c0_42 = arith.constant 0 : index
    %c0_43 = arith.constant 0 : index
    %138 = vector.load %arg11[%137, %c0_42, %c0_43] : memref<8x2x128xf32, #tpu.memory_space<vmem>>, vector<1x2x128xf32>
    %139 = vector.shape_cast %138 : vector<1x2x128xf32> to vector<2x128xf32>
    %cst_44 = arith.constant dense<0.000000e+00> : vector<2x128xf32>
    %140 = tpu.matmul %132, %1, %cst_44 {dimension_numbers = #tpu.dot_dimension_numbers<[1], [0], [0], [1], [0, 0, 1, 1], [], []>} : vector<2x32xf32>, vector<32x128xf32>, vector<2x128xf32> -> vector<2x128xf32>
    %141 = arith.addf %139, %140 : vector<2x128xf32>
    %142 = vector.extract_strided_slice %141 {offsets = [0, 0], sizes = [2, 96], strides = [1, 1]} : vector<2x128xf32> to vector<2x96xf32>
    %143 = arith.negf %142 : vector<2x96xf32>
    %144 = math.exp %143 : vector<2x96xf32>
    %cst_45 = arith.constant 1.000000e+00 : f32
    %145 = vector.broadcast %cst_45 : f32 to vector<2x96xf32>
    %146 = arith.addf %145, %144 : vector<2x96xf32>
    %147 = arith.divf %145, %146 : vector<2x96xf32>
    %148 = vector.extract_strided_slice %147 {offsets = [0, 0], sizes = [2, 32], strides = [1, 1]} : vector<2x96xf32> to vector<2x32xf32>
    %149 = vector.extract_strided_slice %147 {offsets = [0, 32], sizes = [2, 32], strides = [1, 1]} : vector<2x96xf32> to vector<2x32xf32>
    %150 = vector.extract_strided_slice %147 {offsets = [0, 64], sizes = [2, 32], strides = [1, 1]} : vector<2x96xf32> to vector<2x32xf32>
    %151 = vector.extract_strided_slice %141 {offsets = [0, 96], sizes = [2, 32], strides = [1, 1]} : vector<2x128xf32> to vector<2x32xf32>
    %152 = math.tanh %151 : vector<2x32xf32>
    %153 = arith.mulf %149, %130 : vector<2x32xf32>
    %154 = arith.mulf %148, %152 : vector<2x32xf32>
    %155 = arith.addf %153, %154 : vector<2x32xf32>
    %156 = math.tanh %155 : vector<2x32xf32>
    %157 = arith.mulf %150, %156 : vector<2x32xf32>
    %158 = arith.index_cast %c5_i32 : i32 to index
    %c0_46 = arith.constant 0 : index
    %c0_47 = arith.constant 0 : index
    %159 = vector.load %arg12[%158, %c0_46, %c0_47] : memref<8x2x32xf32, #tpu.memory_space<vmem>>, vector<1x2x32xf32>
    %160 = vector.shape_cast %159 : vector<1x2x32xf32> to vector<2x32xf32>
    %161 = vector.shape_cast %157 : vector<2x32xf32> to vector<1x2x32xf32>
    tpu.vector_store %arg12[%158, %c0_46, %c0_47], %161 {strides = array<i32>} : memref<8x2x32xf32, #tpu.memory_space<vmem>>, vector<1x2x32xf32>,
    %c6_i32 = arith.constant 6 : i32
    %162 = arith.index_cast %c6_i32 : i32 to index
    %c0_48 = arith.constant 0 : index
    %c0_49 = arith.constant 0 : index
    %163 = vector.load %arg11[%162, %c0_48, %c0_49] : memref<8x2x128xf32, #tpu.memory_space<vmem>>, vector<1x2x128xf32>
    %164 = vector.shape_cast %163 : vector<1x2x128xf32> to vector<2x128xf32>
    %cst_50 = arith.constant dense<0.000000e+00> : vector<2x128xf32>
    %165 = tpu.matmul %157, %1, %cst_50 {dimension_numbers = #tpu.dot_dimension_numbers<[1], [0], [0], [1], [0, 0, 1, 1], [], []>} : vector<2x32xf32>, vector<32x128xf32>, vector<2x128xf32> -> vector<2x128xf32>
    %166 = arith.addf %164, %165 : vector<2x128xf32>
    %167 = vector.extract_strided_slice %166 {offsets = [0, 0], sizes = [2, 96], strides = [1, 1]} : vector<2x128xf32> to vector<2x96xf32>
    %168 = arith.negf %167 : vector<2x96xf32>
    %169 = math.exp %168 : vector<2x96xf32>
    %cst_51 = arith.constant 1.000000e+00 : f32
    %170 = vector.broadcast %cst_51 : f32 to vector<2x96xf32>
    %171 = arith.addf %170, %169 : vector<2x96xf32>
    %172 = arith.divf %170, %171 : vector<2x96xf32>
    %173 = vector.extract_strided_slice %172 {offsets = [0, 0], sizes = [2, 32], strides = [1, 1]} : vector<2x96xf32> to vector<2x32xf32>
    %174 = vector.extract_strided_slice %172 {offsets = [0, 32], sizes = [2, 32], strides = [1, 1]} : vector<2x96xf32> to vector<2x32xf32>
    %175 = vector.extract_strided_slice %172 {offsets = [0, 64], sizes = [2, 32], strides = [1, 1]} : vector<2x96xf32> to vector<2x32xf32>
    %176 = vector.extract_strided_slice %166 {offsets = [0, 96], sizes = [2, 32], strides = [1, 1]} : vector<2x128xf32> to vector<2x32xf32>
    %177 = math.tanh %176 : vector<2x32xf32>
    %178 = arith.mulf %174, %155 : vector<2x32xf32>
    %179 = arith.mulf %173, %177 : vector<2x32xf32>
    %180 = arith.addf %178, %179 : vector<2x32xf32>
    %181 = math.tanh %180 : vector<2x32xf32>
    %182 = arith.mulf %175, %181 : vector<2x32xf32>
    %183 = arith.index_cast %c6_i32 : i32 to index
    %c0_52 = arith.constant 0 : index
    %c0_53 = arith.constant 0 : index
    %184 = vector.load %arg12[%183, %c0_52, %c0_53] : memref<8x2x32xf32, #tpu.memory_space<vmem>>, vector<1x2x32xf32>
    %185 = vector.shape_cast %184 : vector<1x2x32xf32> to vector<2x32xf32>
    %186 = vector.shape_cast %182 : vector<2x32xf32> to vector<1x2x32xf32>
    tpu.vector_store %arg12[%183, %c0_52, %c0_53], %186 {strides = array<i32>} : memref<8x2x32xf32, #tpu.memory_space<vmem>>, vector<1x2x32xf32>,
    %c7_i32 = arith.constant 7 : i32
    %187 = arith.index_cast %c7_i32 : i32 to index
    %c0_54 = arith.constant 0 : index
    %c0_55 = arith.constant 0 : index
    %188 = vector.load %arg11[%187, %c0_54, %c0_55] : memref<8x2x128xf32, #tpu.memory_space<vmem>>, vector<1x2x128xf32>
    %189 = vector.shape_cast %188 : vector<1x2x128xf32> to vector<2x128xf32>
    %cst_56 = arith.constant dense<0.000000e+00> : vector<2x128xf32>
    %190 = tpu.matmul %182, %1, %cst_56 {dimension_numbers = #tpu.dot_dimension_numbers<[1], [0], [0], [1], [0, 0, 1, 1], [], []>} : vector<2x32xf32>, vector<32x128xf32>, vector<2x128xf32> -> vector<2x128xf32>
    %191 = arith.addf %189, %190 : vector<2x128xf32>
    %192 = vector.extract_strided_slice %191 {offsets = [0, 0], sizes = [2, 96], strides = [1, 1]} : vector<2x128xf32> to vector<2x96xf32>
    %193 = arith.negf %192 : vector<2x96xf32>
    %194 = math.exp %193 : vector<2x96xf32>
    %cst_57 = arith.constant 1.000000e+00 : f32
    %195 = vector.broadcast %cst_57 : f32 to vector<2x96xf32>
    %196 = arith.addf %195, %194 : vector<2x96xf32>
    %197 = arith.divf %195, %196 : vector<2x96xf32>
    %198 = vector.extract_strided_slice %197 {offsets = [0, 0], sizes = [2, 32], strides = [1, 1]} : vector<2x96xf32> to vector<2x32xf32>
    %199 = vector.extract_strided_slice %197 {offsets = [0, 32], sizes = [2, 32], strides = [1, 1]} : vector<2x96xf32> to vector<2x32xf32>
    %200 = vector.extract_strided_slice %197 {offsets = [0, 64], sizes = [2, 32], strides = [1, 1]} : vector<2x96xf32> to vector<2x32xf32>
    %201 = vector.extract_strided_slice %191 {offsets = [0, 96], sizes = [2, 32], strides = [1, 1]} : vector<2x128xf32> to vector<2x32xf32>
    %202 = math.tanh %201 : vector<2x32xf32>
    %203 = arith.mulf %199, %180 : vector<2x32xf32>
    %204 = arith.mulf %198, %202 : vector<2x32xf32>
    %205 = arith.addf %203, %204 : vector<2x32xf32>
    %206 = math.tanh %205 : vector<2x32xf32>
    %207 = arith.mulf %200, %206 : vector<2x32xf32>
    %208 = arith.index_cast %c7_i32 : i32 to index
    %c0_58 = arith.constant 0 : index
    %c0_59 = arith.constant 0 : index
    %209 = vector.load %arg12[%208, %c0_58, %c0_59] : memref<8x2x32xf32, #tpu.memory_space<vmem>>, vector<1x2x32xf32>
    %210 = vector.shape_cast %209 : vector<1x2x32xf32> to vector<2x32xf32>
    %211 = vector.shape_cast %207 : vector<2x32xf32> to vector<1x2x32xf32>
    tpu.vector_store %arg12[%208, %c0_58, %c0_59], %211 {strides = array<i32>} : memref<8x2x32xf32, #tpu.memory_space<vmem>>, vector<1x2x32xf32>,
    %c8_i32 = arith.constant 8 : i32
    %c0_60 = arith.constant 0 : index
    %c0_61 = arith.constant 0 : index
    %212 = vector.load %arg5[%c0_60, %c0_61] : memref<32x128xf32, #tpu.memory_space<vmem>>, vector<32x128xf32>
    %c0_62 = arith.constant 0 : index
    %c0_63 = arith.constant 0 : index
    %213 = vector.load %arg6[%c0_62, %c0_63] : memref<32x128xf32, #tpu.memory_space<vmem>>, vector<32x128xf32>
    %c0_64 = arith.constant 0 : index
    %c0_65 = arith.constant 0 : index
    %214 = vector.load %arg7[%c0_64, %c0_65] : memref<1x128xf32, #tpu.memory_space<vmem>>, vector<1x128xf32>
    %c0_66 = arith.constant 0 : index
    %c0_67 = arith.constant 0 : index
    %c0_68 = arith.constant 0 : index
    %215 = vector.load %arg12[%c0_66, %c0_67, %c0_68] : memref<8x2x32xf32, #tpu.memory_space<vmem>>, vector<8x2x32xf32>
    %216 = vector.shape_cast %215 : vector<8x2x32xf32> to vector<16x32xf32>
    %cst_69 = arith.constant dense<0.000000e+00> : vector<16x128xf32>
    %217 = tpu.matmul %216, %212, %cst_69 {dimension_numbers = #tpu.dot_dimension_numbers<[1], [0], [0], [1], [0, 0, 1, 1], [], []>} : vector<16x32xf32>, vector<32x128xf32>, vector<16x128xf32> -> vector<16x128xf32>
    %218 = vector.broadcast %214 : vector<1x128xf32> to vector<16x128xf32>
    %219 = arith.addf %217, %218 : vector<16x128xf32>
    %220 = vector.shape_cast %219 : vector<16x128xf32> to vector<8x2x128xf32>
    %c0_70 = arith.constant 0 : index
    %c0_71 = arith.constant 0 : index
    %c0_72 = arith.constant 0 : index
    %221 = vector.load %arg11[%c0_70, %c0_71, %c0_72] : memref<8x2x128xf32, #tpu.memory_space<vmem>>, vector<8x2x128xf32>
    tpu.vector_store %arg11[%c0_70, %c0_71, %c0_72], %220 {strides = array<i32>} : memref<8x2x128xf32, #tpu.memory_space<vmem>>, vector<8x2x128xf32>,
    %cst_73 = arith.constant 0.000000e+00 : f32
    %222 = vector.broadcast %cst_73 : f32 to vector<2x32xf32>
    %c0_i32_74 = arith.constant 0 : i32
    %223 = arith.index_cast %c0_i32_74 : i32 to index
    %c0_75 = arith.constant 0 : index
    %c0_76 = arith.constant 0 : index
    %224 = vector.load %arg11[%223, %c0_75, %c0_76] : memref<8x2x128xf32, #tpu.memory_space<vmem>>, vector<1x2x128xf32>
    %225 = vector.shape_cast %224 : vector<1x2x128xf32> to vector<2x128xf32>
    %cst_77 = arith.constant dense<0.000000e+00> : vector<2x128xf32>
    %226 = tpu.matmul %222, %213, %cst_77 {dimension_numbers = #tpu.dot_dimension_numbers<[1], [0], [0], [1], [0, 0, 1, 1], [], []>} : vector<2x32xf32>, vector<32x128xf32>, vector<2x128xf32> -> vector<2x128xf32>
    %227 = arith.addf %225, %226 : vector<2x128xf32>
    %228 = vector.extract_strided_slice %227 {offsets = [0, 0], sizes = [2, 96], strides = [1, 1]} : vector<2x128xf32> to vector<2x96xf32>
    %229 = arith.negf %228 : vector<2x96xf32>
    %230 = math.exp %229 : vector<2x96xf32>
    %cst_78 = arith.constant 1.000000e+00 : f32
    %231 = vector.broadcast %cst_78 : f32 to vector<2x96xf32>
    %232 = arith.addf %231, %230 : vector<2x96xf32>
    %233 = arith.divf %231, %232 : vector<2x96xf32>
    %234 = vector.extract_strided_slice %233 {offsets = [0, 0], sizes = [2, 32], strides = [1, 1]} : vector<2x96xf32> to vector<2x32xf32>
    %235 = vector.extract_strided_slice %233 {offsets = [0, 32], sizes = [2, 32], strides = [1, 1]} : vector<2x96xf32> to vector<2x32xf32>
    %236 = vector.extract_strided_slice %233 {offsets = [0, 64], sizes = [2, 32], strides = [1, 1]} : vector<2x96xf32> to vector<2x32xf32>
    %237 = vector.extract_strided_slice %227 {offsets = [0, 96], sizes = [2, 32], strides = [1, 1]} : vector<2x128xf32> to vector<2x32xf32>
    %238 = math.tanh %237 : vector<2x32xf32>
    %239 = arith.mulf %235, %222 : vector<2x32xf32>
    %240 = arith.mulf %234, %238 : vector<2x32xf32>
    %241 = arith.addf %239, %240 : vector<2x32xf32>
    %242 = math.tanh %241 : vector<2x32xf32>
    %243 = arith.mulf %236, %242 : vector<2x32xf32>
    %c1_i32_79 = arith.constant 1 : i32
    %244 = arith.index_cast %c1_i32_79 : i32 to index
    %c0_80 = arith.constant 0 : index
    %c0_81 = arith.constant 0 : index
    %245 = vector.load %arg11[%244, %c0_80, %c0_81] : memref<8x2x128xf32, #tpu.memory_space<vmem>>, vector<1x2x128xf32>
    %246 = vector.shape_cast %245 : vector<1x2x128xf32> to vector<2x128xf32>
    %cst_82 = arith.constant dense<0.000000e+00> : vector<2x128xf32>
    %247 = tpu.matmul %243, %213, %cst_82 {dimension_numbers = #tpu.dot_dimension_numbers<[1], [0], [0], [1], [0, 0, 1, 1], [], []>} : vector<2x32xf32>, vector<32x128xf32>, vector<2x128xf32> -> vector<2x128xf32>
    %248 = arith.addf %246, %247 : vector<2x128xf32>
    %249 = vector.extract_strided_slice %248 {offsets = [0, 0], sizes = [2, 96], strides = [1, 1]} : vector<2x128xf32> to vector<2x96xf32>
    %250 = arith.negf %249 : vector<2x96xf32>
    %251 = math.exp %250 : vector<2x96xf32>
    %cst_83 = arith.constant 1.000000e+00 : f32
    %252 = vector.broadcast %cst_83 : f32 to vector<2x96xf32>
    %253 = arith.addf %252, %251 : vector<2x96xf32>
    %254 = arith.divf %252, %253 : vector<2x96xf32>
    %255 = vector.extract_strided_slice %254 {offsets = [0, 0], sizes = [2, 32], strides = [1, 1]} : vector<2x96xf32> to vector<2x32xf32>
    %256 = vector.extract_strided_slice %254 {offsets = [0, 32], sizes = [2, 32], strides = [1, 1]} : vector<2x96xf32> to vector<2x32xf32>
    %257 = vector.extract_strided_slice %254 {offsets = [0, 64], sizes = [2, 32], strides = [1, 1]} : vector<2x96xf32> to vector<2x32xf32>
    %258 = vector.extract_strided_slice %248 {offsets = [0, 96], sizes = [2, 32], strides = [1, 1]} : vector<2x128xf32> to vector<2x32xf32>
    %259 = math.tanh %258 : vector<2x32xf32>
    %260 = arith.mulf %256, %241 : vector<2x32xf32>
    %261 = arith.mulf %255, %259 : vector<2x32xf32>
    %262 = arith.addf %260, %261 : vector<2x32xf32>
    %263 = math.tanh %262 : vector<2x32xf32>
    %264 = arith.mulf %257, %263 : vector<2x32xf32>
    %c2_i32_84 = arith.constant 2 : i32
    %265 = arith.index_cast %c2_i32_84 : i32 to index
    %c0_85 = arith.constant 0 : index
    %c0_86 = arith.constant 0 : index
    %266 = vector.load %arg11[%265, %c0_85, %c0_86] : memref<8x2x128xf32, #tpu.memory_space<vmem>>, vector<1x2x128xf32>
    %267 = vector.shape_cast %266 : vector<1x2x128xf32> to vector<2x128xf32>
    %cst_87 = arith.constant dense<0.000000e+00> : vector<2x128xf32>
    %268 = tpu.matmul %264, %213, %cst_87 {dimension_numbers = #tpu.dot_dimension_numbers<[1], [0], [0], [1], [0, 0, 1, 1], [], []>} : vector<2x32xf32>, vector<32x128xf32>, vector<2x128xf32> -> vector<2x128xf32>
    %269 = arith.addf %267, %268 : vector<2x128xf32>
    %270 = vector.extract_strided_slice %269 {offsets = [0, 0], sizes = [2, 96], strides = [1, 1]} : vector<2x128xf32> to vector<2x96xf32>
    %271 = arith.negf %270 : vector<2x96xf32>
    %272 = math.exp %271 : vector<2x96xf32>
    %cst_88 = arith.constant 1.000000e+00 : f32
    %273 = vector.broadcast %cst_88 : f32 to vector<2x96xf32>
    %274 = arith.addf %273, %272 : vector<2x96xf32>
    %275 = arith.divf %273, %274 : vector<2x96xf32>
    %276 = vector.extract_strided_slice %275 {offsets = [0, 0], sizes = [2, 32], strides = [1, 1]} : vector<2x96xf32> to vector<2x32xf32>
    %277 = vector.extract_strided_slice %275 {offsets = [0, 32], sizes = [2, 32], strides = [1, 1]} : vector<2x96xf32> to vector<2x32xf32>
    %278 = vector.extract_strided_slice %275 {offsets = [0, 64], sizes = [2, 32], strides = [1, 1]} : vector<2x96xf32> to vector<2x32xf32>
    %279 = vector.extract_strided_slice %269 {offsets = [0, 96], sizes = [2, 32], strides = [1, 1]} : vector<2x128xf32> to vector<2x32xf32>
    %280 = math.tanh %279 : vector<2x32xf32>
    %281 = arith.mulf %277, %262 : vector<2x32xf32>
    %282 = arith.mulf %276, %280 : vector<2x32xf32>
    %283 = arith.addf %281, %282 : vector<2x32xf32>
    %284 = math.tanh %283 : vector<2x32xf32>
    %285 = arith.mulf %278, %284 : vector<2x32xf32>
    %c3_i32_89 = arith.constant 3 : i32
    %286 = arith.index_cast %c3_i32_89 : i32 to index
    %c0_90 = arith.constant 0 : index
    %c0_91 = arith.constant 0 : index
    %287 = vector.load %arg11[%286, %c0_90, %c0_91] : memref<8x2x128xf32, #tpu.memory_space<vmem>>, vector<1x2x128xf32>
    %288 = vector.shape_cast %287 : vector<1x2x128xf32> to vector<2x128xf32>
    %cst_92 = arith.constant dense<0.000000e+00> : vector<2x128xf32>
    %289 = tpu.matmul %285, %213, %cst_92 {dimension_numbers = #tpu.dot_dimension_numbers<[1], [0], [0], [1], [0, 0, 1, 1], [], []>} : vector<2x32xf32>, vector<32x128xf32>, vector<2x128xf32> -> vector<2x128xf32>
    %290 = arith.addf %288, %289 : vector<2x128xf32>
    %291 = vector.extract_strided_slice %290 {offsets = [0, 0], sizes = [2, 96], strides = [1, 1]} : vector<2x128xf32> to vector<2x96xf32>
    %292 = arith.negf %291 : vector<2x96xf32>
    %293 = math.exp %292 : vector<2x96xf32>
    %cst_93 = arith.constant 1.000000e+00 : f32
    %294 = vector.broadcast %cst_93 : f32 to vector<2x96xf32>
    %295 = arith.addf %294, %293 : vector<2x96xf32>
    %296 = arith.divf %294, %295 : vector<2x96xf32>
    %297 = vector.extract_strided_slice %296 {offsets = [0, 0], sizes = [2, 32], strides = [1, 1]} : vector<2x96xf32> to vector<2x32xf32>
    %298 = vector.extract_strided_slice %296 {offsets = [0, 32], sizes = [2, 32], strides = [1, 1]} : vector<2x96xf32> to vector<2x32xf32>
    %299 = vector.extract_strided_slice %296 {offsets = [0, 64], sizes = [2, 32], strides = [1, 1]} : vector<2x96xf32> to vector<2x32xf32>
    %300 = vector.extract_strided_slice %290 {offsets = [0, 96], sizes = [2, 32], strides = [1, 1]} : vector<2x128xf32> to vector<2x32xf32>
    %301 = math.tanh %300 : vector<2x32xf32>
    %302 = arith.mulf %298, %283 : vector<2x32xf32>
    %303 = arith.mulf %297, %301 : vector<2x32xf32>
    %304 = arith.addf %302, %303 : vector<2x32xf32>
    %305 = math.tanh %304 : vector<2x32xf32>
    %306 = arith.mulf %299, %305 : vector<2x32xf32>
    %c4_i32_94 = arith.constant 4 : i32
    %307 = arith.index_cast %c4_i32_94 : i32 to index
    %c0_95 = arith.constant 0 : index
    %c0_96 = arith.constant 0 : index
    %308 = vector.load %arg11[%307, %c0_95, %c0_96] : memref<8x2x128xf32, #tpu.memory_space<vmem>>, vector<1x2x128xf32>
    %309 = vector.shape_cast %308 : vector<1x2x128xf32> to vector<2x128xf32>
    %cst_97 = arith.constant dense<0.000000e+00> : vector<2x128xf32>
    %310 = tpu.matmul %306, %213, %cst_97 {dimension_numbers = #tpu.dot_dimension_numbers<[1], [0], [0], [1], [0, 0, 1, 1], [], []>} : vector<2x32xf32>, vector<32x128xf32>, vector<2x128xf32> -> vector<2x128xf32>
    %311 = arith.addf %309, %310 : vector<2x128xf32>
    %312 = vector.extract_strided_slice %311 {offsets = [0, 0], sizes = [2, 96], strides = [1, 1]} : vector<2x128xf32> to vector<2x96xf32>
    %313 = arith.negf %312 : vector<2x96xf32>
    %314 = math.exp %313 : vector<2x96xf32>
    %cst_98 = arith.constant 1.000000e+00 : f32
    %315 = vector.broadcast %cst_98 : f32 to vector<2x96xf32>
    %316 = arith.addf %315, %314 : vector<2x96xf32>
    %317 = arith.divf %315, %316 : vector<2x96xf32>
    %318 = vector.extract_strided_slice %317 {offsets = [0, 0], sizes = [2, 32], strides = [1, 1]} : vector<2x96xf32> to vector<2x32xf32>
    %319 = vector.extract_strided_slice %317 {offsets = [0, 32], sizes = [2, 32], strides = [1, 1]} : vector<2x96xf32> to vector<2x32xf32>
    %320 = vector.extract_strided_slice %317 {offsets = [0, 64], sizes = [2, 32], strides = [1, 1]} : vector<2x96xf32> to vector<2x32xf32>
    %321 = vector.extract_strided_slice %311 {offsets = [0, 96], sizes = [2, 32], strides = [1, 1]} : vector<2x128xf32> to vector<2x32xf32>
    %322 = math.tanh %321 : vector<2x32xf32>
    %323 = arith.mulf %319, %304 : vector<2x32xf32>
    %324 = arith.mulf %318, %322 : vector<2x32xf32>
    %325 = arith.addf %323, %324 : vector<2x32xf32>
    %326 = math.tanh %325 : vector<2x32xf32>
    %327 = arith.mulf %320, %326 : vector<2x32xf32>
    %c5_i32_99 = arith.constant 5 : i32
    %328 = arith.index_cast %c5_i32_99 : i32 to index
    %c0_100 = arith.constant 0 : index
    %c0_101 = arith.constant 0 : index
    %329 = vector.load %arg11[%328, %c0_100, %c0_101] : memref<8x2x128xf32, #tpu.memory_space<vmem>>, vector<1x2x128xf32>
    %330 = vector.shape_cast %329 : vector<1x2x128xf32> to vector<2x128xf32>
    %cst_102 = arith.constant dense<0.000000e+00> : vector<2x128xf32>
    %331 = tpu.matmul %327, %213, %cst_102 {dimension_numbers = #tpu.dot_dimension_numbers<[1], [0], [0], [1], [0, 0, 1, 1], [], []>} : vector<2x32xf32>, vector<32x128xf32>, vector<2x128xf32> -> vector<2x128xf32>
    %332 = arith.addf %330, %331 : vector<2x128xf32>
    %333 = vector.extract_strided_slice %332 {offsets = [0, 0], sizes = [2, 96], strides = [1, 1]} : vector<2x128xf32> to vector<2x96xf32>
    %334 = arith.negf %333 : vector<2x96xf32>
    %335 = math.exp %334 : vector<2x96xf32>
    %cst_103 = arith.constant 1.000000e+00 : f32
    %336 = vector.broadcast %cst_103 : f32 to vector<2x96xf32>
    %337 = arith.addf %336, %335 : vector<2x96xf32>
    %338 = arith.divf %336, %337 : vector<2x96xf32>
    %339 = vector.extract_strided_slice %338 {offsets = [0, 0], sizes = [2, 32], strides = [1, 1]} : vector<2x96xf32> to vector<2x32xf32>
    %340 = vector.extract_strided_slice %338 {offsets = [0, 32], sizes = [2, 32], strides = [1, 1]} : vector<2x96xf32> to vector<2x32xf32>
    %341 = vector.extract_strided_slice %338 {offsets = [0, 64], sizes = [2, 32], strides = [1, 1]} : vector<2x96xf32> to vector<2x32xf32>
    %342 = vector.extract_strided_slice %332 {offsets = [0, 96], sizes = [2, 32], strides = [1, 1]} : vector<2x128xf32> to vector<2x32xf32>
    %343 = math.tanh %342 : vector<2x32xf32>
    %344 = arith.mulf %340, %325 : vector<2x32xf32>
    %345 = arith.mulf %339, %343 : vector<2x32xf32>
    %346 = arith.addf %344, %345 : vector<2x32xf32>
    %347 = math.tanh %346 : vector<2x32xf32>
    %348 = arith.mulf %341, %347 : vector<2x32xf32>
    %c6_i32_104 = arith.constant 6 : i32
    %349 = arith.index_cast %c6_i32_104 : i32 to index
    %c0_105 = arith.constant 0 : index
    %c0_106 = arith.constant 0 : index
    %350 = vector.load %arg11[%349, %c0_105, %c0_106] : memref<8x2x128xf32, #tpu.memory_space<vmem>>, vector<1x2x128xf32>
    %351 = vector.shape_cast %350 : vector<1x2x128xf32> to vector<2x128xf32>
    %cst_107 = arith.constant dense<0.000000e+00> : vector<2x128xf32>
    %352 = tpu.matmul %348, %213, %cst_107 {dimension_numbers = #tpu.dot_dimension_numbers<[1], [0], [0], [1], [0, 0, 1, 1], [], []>} : vector<2x32xf32>, vector<32x128xf32>, vector<2x128xf32> -> vector<2x128xf32>
    %353 = arith.addf %351, %352 : vector<2x128xf32>
    %354 = vector.extract_strided_slice %353 {offsets = [0, 0], sizes = [2, 96], strides = [1, 1]} : vector<2x128xf32> to vector<2x96xf32>
    %355 = arith.negf %354 : vector<2x96xf32>
    %356 = math.exp %355 : vector<2x96xf32>
    %cst_108 = arith.constant 1.000000e+00 : f32
    %357 = vector.broadcast %cst_108 : f32 to vector<2x96xf32>
    %358 = arith.addf %357, %356 : vector<2x96xf32>
    %359 = arith.divf %357, %358 : vector<2x96xf32>
    %360 = vector.extract_strided_slice %359 {offsets = [0, 0], sizes = [2, 32], strides = [1, 1]} : vector<2x96xf32> to vector<2x32xf32>
    %361 = vector.extract_strided_slice %359 {offsets = [0, 32], sizes = [2, 32], strides = [1, 1]} : vector<2x96xf32> to vector<2x32xf32>
    %362 = vector.extract_strided_slice %359 {offsets = [0, 64], sizes = [2, 32], strides = [1, 1]} : vector<2x96xf32> to vector<2x32xf32>
    %363 = vector.extract_strided_slice %353 {offsets = [0, 96], sizes = [2, 32], strides = [1, 1]} : vector<2x128xf32> to vector<2x32xf32>
    %364 = math.tanh %363 : vector<2x32xf32>
    %365 = arith.mulf %361, %346 : vector<2x32xf32>
    %366 = arith.mulf %360, %364 : vector<2x32xf32>
    %367 = arith.addf %365, %366 : vector<2x32xf32>
    %368 = math.tanh %367 : vector<2x32xf32>
    %369 = arith.mulf %362, %368 : vector<2x32xf32>
    %c7_i32_109 = arith.constant 7 : i32
    %370 = arith.index_cast %c7_i32_109 : i32 to index
    %c0_110 = arith.constant 0 : index
    %c0_111 = arith.constant 0 : index
    %371 = vector.load %arg11[%370, %c0_110, %c0_111] : memref<8x2x128xf32, #tpu.memory_space<vmem>>, vector<1x2x128xf32>
    %372 = vector.shape_cast %371 : vector<1x2x128xf32> to vector<2x128xf32>
    %cst_112 = arith.constant dense<0.000000e+00> : vector<2x128xf32>
    %373 = tpu.matmul %369, %213, %cst_112 {dimension_numbers = #tpu.dot_dimension_numbers<[1], [0], [0], [1], [0, 0, 1, 1], [], []>} : vector<2x32xf32>, vector<32x128xf32>, vector<2x128xf32> -> vector<2x128xf32>
    %374 = arith.addf %372, %373 : vector<2x128xf32>
    %375 = vector.extract_strided_slice %374 {offsets = [0, 0], sizes = [2, 96], strides = [1, 1]} : vector<2x128xf32> to vector<2x96xf32>
    %376 = arith.negf %375 : vector<2x96xf32>
    %377 = math.exp %376 : vector<2x96xf32>
    %cst_113 = arith.constant 1.000000e+00 : f32
    %378 = vector.broadcast %cst_113 : f32 to vector<2x96xf32>
    %379 = arith.addf %378, %377 : vector<2x96xf32>
    %380 = arith.divf %378, %379 : vector<2x96xf32>
    %381 = vector.extract_strided_slice %380 {offsets = [0, 0], sizes = [2, 32], strides = [1, 1]} : vector<2x96xf32> to vector<2x32xf32>
    %382 = vector.extract_strided_slice %380 {offsets = [0, 32], sizes = [2, 32], strides = [1, 1]} : vector<2x96xf32> to vector<2x32xf32>
    %383 = vector.extract_strided_slice %380 {offsets = [0, 64], sizes = [2, 32], strides = [1, 1]} : vector<2x96xf32> to vector<2x32xf32>
    %384 = vector.extract_strided_slice %374 {offsets = [0, 96], sizes = [2, 32], strides = [1, 1]} : vector<2x128xf32> to vector<2x32xf32>
    %385 = math.tanh %384 : vector<2x32xf32>
    %386 = arith.mulf %382, %367 : vector<2x32xf32>
    %387 = arith.mulf %381, %385 : vector<2x32xf32>
    %388 = arith.addf %386, %387 : vector<2x32xf32>
    %389 = math.tanh %388 : vector<2x32xf32>
    %390 = arith.mulf %383, %389 : vector<2x32xf32>
    %c8_i32_114 = arith.constant 8 : i32
    %c0_115 = arith.constant 0 : index
    %c0_116 = arith.constant 0 : index
    %391 = vector.load %arg8[%c0_115, %c0_116] : memref<32x8xf32, #tpu.memory_space<vmem>>, vector<32x8xf32>
    %cst_117 = arith.constant dense<0.000000e+00> : vector<2x8xf32>
    %392 = tpu.matmul %390, %391, %cst_117 {dimension_numbers = #tpu.dot_dimension_numbers<[1], [0], [0], [1], [0, 0, 1, 1], [], []>} : vector<2x32xf32>, vector<32x8xf32>, vector<2x8xf32> -> vector<2x8xf32>
    %c0_118 = arith.constant 0 : index
    %c0_119 = arith.constant 0 : index
    %393 = vector.load %arg9[%c0_118, %c0_119] : memref<1x8xf32, #tpu.memory_space<vmem>>, vector<1x8xf32>
    %394 = vector.broadcast %393 : vector<1x8xf32> to vector<2x8xf32>
    %395 = arith.addf %392, %394 : vector<2x8xf32>
    %c0_120 = arith.constant 0 : index
    %c0_121 = arith.constant 0 : index
    %396 = vector.load %arg10[%c0_120, %c0_121] : memref<2x8xf32, #tpu.memory_space<vmem>>, vector<2x8xf32>
    tpu.vector_store %arg10[%c0_120, %c0_121], %395 {strides = array<i32>} : memref<2x8xf32, #tpu.memory_space<vmem>>, vector<2x8xf32>,
    return
  }
  func.func @transform_0(%arg0: i32) -> (i32, i32, i32) {
    %c0_i32 = arith.constant 0 : i32
    %c0_i32_0 = arith.constant 0 : i32
    %c0_i32_1 = arith.constant 0 : i32
    %c0_i32_2 = arith.constant 0 : i32
    return %c0_i32, %c0_i32_0, %c0_i32_1 : i32, i32, i32
  }
  func.func @transform_1(%arg0: i32) -> (i32, i32) {
    %c0_i32 = arith.constant 0 : i32
    %c0_i32_0 = arith.constant 0 : i32
    %c0_i32_1 = arith.constant 0 : i32
    return %c0_i32, %c0_i32_0 : i32, i32
  }
  func.func @transform_2(%arg0: i32) -> (i32, i32) {
    %c0_i32 = arith.constant 0 : i32
    %c0_i32_0 = arith.constant 0 : i32
    %c0_i32_1 = arith.constant 0 : i32
    return %c0_i32, %c0_i32_0 : i32, i32
  }
  func.func @transform_3(%arg0: i32) -> (i32, i32) {
    %c0_i32 = arith.constant 0 : i32
    %c0_i32_0 = arith.constant 0 : i32
    %c0_i32_1 = arith.constant 0 : i32
    return %c0_i32, %c0_i32_0 : i32, i32
  }
  func.func @transform_4(%arg0: i32) -> (i32, i32) {
    %c0_i32 = arith.constant 0 : i32
    %c0_i32_0 = arith.constant 0 : i32
    %c0_i32_1 = arith.constant 0 : i32
    return %c0_i32, %c0_i32_0 : i32, i32
  }
  func.func @transform_5(%arg0: i32) -> (i32, i32) {
    %c0_i32 = arith.constant 0 : i32
    %c0_i32_0 = arith.constant 0 : i32
    %c0_i32_1 = arith.constant 0 : i32
    return %c0_i32, %c0_i32_0 : i32, i32
  }
  func.func @transform_6(%arg0: i32) -> (i32, i32) {
    %c0_i32 = arith.constant 0 : i32
    %c0_i32_0 = arith.constant 0 : i32
    %c0_i32_1 = arith.constant 0 : i32
    return %c0_i32, %c0_i32_0 : i32, i32
  }
  func.func @transform_7(%arg0: i32) -> (i32, i32) {
    %c0_i32 = arith.constant 0 : i32
    %c0_i32_0 = arith.constant 0 : i32
    %c0_i32_1 = arith.constant 0 : i32
    return %c0_i32, %c0_i32_0 : i32, i32
  }
  func.func @transform_8(%arg0: i32) -> (i32, i32) {
    %c0_i32 = arith.constant 0 : i32
    %c0_i32_0 = arith.constant 0 : i32
    %c0_i32_1 = arith.constant 0 : i32
    return %c0_i32, %c0_i32_0 : i32, i32
  }
  func.func @transform_9(%arg0: i32) -> (i32, i32) {
    %c0_i32 = arith.constant 0 : i32
    %c0_i32_0 = arith.constant 0 : i32
    %c0_i32_1 = arith.constant 0 : i32
    return %c0_i32, %c0_i32_0 : i32, i32
  }
}

</mosaic_0001>

<bundles_post_ra>
// kernel: lstm_feature_extractor_forward.1
= control target key start
LH: loop header
LB: loop body
LE: loop exit
PB: predicated region body
PF: predicated region fallthrough
CT: control target
= control target key end

     0   :  { %14 = vsyncpa [#allocation5], 0  ;;  %s3307_s0 = inlined_call_operand.hbm [shape: f32[2,8,16], index: 0, kind: input, shape index: {}]   ;;  %s3308_s1 = inlined_call_operand.hbm [shape: f32[16,128], index: 1, kind: input, shape index: {}]   ;;  %s3309_s2 = inlined_call_operand.vmem [shape: f32[32,128], index: 2, kind: input, shape index: {}]   ;;  %s3310_s3 = inlined_call_operand.vmem [shape: f32[1,128], index: 3, kind: input, shape index: {}]   ;;  %s3311_s4 = inlined_call_operand.hbm [shape: f32[32,128], index: 4, kind: input, shape index: {}]   ;;  %s3312_s5 = inlined_call_operand.hbm [shape: f32[32,128], index: 5, kind: input, shape index: {}]   ;;  %s3313_s6 = inlined_call_operand.vmem [shape: f32[1,128], index: 6, kind: input, shape index: {}]   ;;  %s3314_s7 = inlined_call_operand.vmem [shape: f32[32,8], index: 7, kind: input, shape index: {}]   ;;  %s3315_s8 = inlined_call_operand.vmem [shape: f32[1,8], index: 8, kind: input, shape index: {}]   ;;  %s3316_s9 = inlined_call_operand.hbm [shape: f32[2,8], index: 9, kind: output, shape index: {}]  }
   0x1   :  { %15 = vsyncpa [#allocation8], 0 }
   0x2   :  { %16 = vsyncpa [#allocation11], 0 }
   0x3   :  { %17 = vsyncpa [#allocation6], 0  ;;  %s2883_s30 = smov [#allocation7]   ;;  %s2884_s11 = smov [#allocation4]  }
   0x4   :  { %s35_s10 = sshll.u32 %s2883_s30, 4  ;;  %s23_s12 = sshll.u32 %s2884_s11, 4  ;;  %s36_s10 = int_to_ptr.vmem [resolvable:$true] %s35_s10  ;;  %s24_s12 = int_to_ptr.vmem [resolvable:$true] %s23_s12 }
   0x5   :  { %s2783_s13 = scalar_lea.vmem %s36_s10, 256  ;;  %p2788_p1 = scmp.lt.s32.totalorder %s36_s10, %s36_s10 }
   0x6   :  { %p2784_p0 = scmp.ne.s32.totalorder %s36_s10, %s2783_s13  ;;  %p2789_p2 = scmp.lt.s32.totalorder %s2783_s13, %s2783_s13 }
   0x8   :  { %p2790_p3 = por %p2789_p2, %p2788_p1 }
   0xa   :  { %p2791_p4 = pnand %p2790_p3, %p2784_p0 }
   0xc   :  { %2794 = shalt.err (!%p2791_p4)
}
   0xd   :  { %s2885_s14 = smov 128   ;;  %s2886_s15 = smov 8  }
   0xe   :  { %41 = dma.hbm_to_vmem [thread:$0]  %s3308_s1, 256, %s36_s10, [#allocation8], %s2885_s14, %s2885_s14, %s2886_s15  }
   0xf   :  { %s2803_s18 = scalar_lea.vmem %s24_s12, 256  ;;  %p2808_p6 = scmp.lt.s32.totalorder %s24_s12, %s24_s12 }
  0x10   :  { %p2804_p5 = scmp.ne.s32.totalorder %s24_s12, %s2803_s18  ;;  %p2809_p7 = scmp.lt.s32.totalorder %s2803_s18, %s2803_s18 }
  0x12   :  { %p2810_p8 = por %p2809_p7, %p2808_p6 }
  0x14   :  { %p2811_p9 = pnand %p2810_p8, %p2804_p5 }
  0x16   :  { %2814 = shalt.err (!%p2811_p9)
}
  0x17   :  { %29 = dma.hbm_to_vmem [thread:$0]  %s3307_s0, 256, %s24_s12, [#allocation5], %s2885_s14, %s2885_s14, %s2886_s15  }
  0x18   :  { %s2887_s21 = smov [#allocation9]   ;;  %s2888_s23 = smov [#allocation10]  }
  0x19   :  { %s51_s22 = sshll.u32 %s2887_s21, 4  ;;  %s63_s24 = sshll.u32 %s2888_s23, 4  ;;  %s52_s22 = int_to_ptr.vmem [resolvable:$true] %s51_s22  ;;  %s64_s24 = int_to_ptr.vmem [resolvable:$true] %s63_s24 }
  0x1a   :  { %s2823_s1 = scalar_lea.vmem %s52_s22, 512  ;;  %p2828_p11 = scmp.lt.s32.totalorder %s52_s22, %s52_s22 }
  0x1b   :  { %p2824_p10 = scmp.ne.s32.totalorder %s52_s22, %s2823_s1  ;;  %p2829_p12 = scmp.lt.s32.totalorder %s2823_s1, %s2823_s1 }
  0x1d   :  { %p2830_p13 = por %p2829_p12, %p2828_p11 }
  0x1f   :  { %p2831_p0 = pnand %p2830_p13, %p2824_p10 }
  0x21   :  { %2834 = shalt.err (!%p2831_p0)
}
  0x22   :  { %57 = dma.hbm_to_vmem [thread:$0]  %s3311_s4, 512, %s52_s22, [#allocation8], %s2885_s14, %s2885_s14, %s2886_s15  }
  0x23   :  { %s2843_s0 = scalar_lea.vmem %s64_s24, 512  ;;  %p2848_p2 = scmp.lt.s32.totalorder %s64_s24, %s64_s24 }
  0x24   :  { %p2844_p1 = scmp.ne.s32.totalorder %s64_s24, %s2843_s0  ;;  %p2849_p3 = scmp.lt.s32.totalorder %s2843_s0, %s2843_s0 }
  0x26   :  { %p2850_p4 = por %p2849_p3, %p2848_p2 }
  0x28   :  { %p2851_p5 = pnand %p2850_p4, %p2844_p1 }
  0x2a   :  { %2854 = shalt.err (!%p2851_p5)
}
  0x2b   :  { %69 = dma.hbm_to_vmem [thread:$0]  %s3312_s5, 512, %s64_s24, [#allocation11], %s2885_s14, %s2885_s14, %s2886_s15  }
  0x2c   :  { %2875 = dma.done.wait [#allocation5], 256  }
  0x2d   :  { %2876 = vsyncadd [#allocation5], 4294967040 }
  0x2e   :  { %2877 = dma.done.wait [#allocation8], 768  }
  0x2f   :  { %2878 = vsyncadd [#allocation8], 4294966528 }
  0x30   :  { %2879 = dma.done.wait [#allocation11], 512  }
  0x31   :  { %2880 = vsyncadd [#allocation11], 4294966784  ;;  %v101_v0 = vlaneseq  ;;  %v2889_v1 = vmov 1983009808   ;;  %v2890_v3 = vmov 0.0   ;;  %vm2892_vm0 = vmmov 0  }
  0x32   :  { %v99_v2 = vunpack.c.l.s4 %v2889_v1  ;;  %2436 = vmatprep.subr.mxu1 %v2890_v3  ;;  %v2891_v5 = vmov 1934713408   ;;  %2444 = vmatprep.mubr.msk.f32.mxu1 %vm2892_vm0, %v2890_v3  ;;  %v89_v10 = vld [vmem:[#allocation7 + $0x8] sm:$0xff]  ;;  %v88_v11 = vld [vmem:[#allocation7] sm:$0xff]  ;;  %v95_v12 = vld [vmem:[#allocation4] sm:$0xff]  ;;  %vm211_vm1 = vcmask 130048  }
  0x33   :  { %v102_v4 = vshrl.u32 %v101_v0, 7  ;;  %v130_v6 = vunpack.c.l.s4 %v2891_v5  ;;  %2429 = vmatprep.subr.mxu0 %v89_v10  ;;  %v96_v13 = vld [vmem:[#allocation4 + $0x8] sm:$0xff]  ;;  %v97_v14 = vcombine.high %v95_v12, %v2890_v3  ;;  %v2980_v16 = vld [vmem:[%s3309_s2 + $0x18] sm:$0xff]  ;;  %v2985_v17 = vld [vmem:[%s3309_s2 + $0x10] sm:$0xff]  ;;  %s2894_s15 = smov 64   ;;  %vm447_vm2 = vcmask 254976  }
  0x34   :  { %v100_v7 = vunpack.c.0.s8 %v99_v2  ;;  %2430 = vmatpush3.msra.mxu0 %v89_v10  ;;  %v112_v18 = vcombine.high %v96_v13, %v2890_v3  ;;  %2437 = vmatpush3.msra.mxu1 %v2980_v16  ;;  %v2995_v22 = vld [vmem:[%s3309_s2 + $0x8] sm:$0xff]  ;;  %v3003_v26 = vld [vmem:[%s3309_s2] sm:$0xff]  ;;  %vm344_vm3 = vcmask 261120   ;;  %s2895_s26 = smov [#allocation12]   ;;  %vm2269_vm4 = vcmask 58368  }
  0x35   :  { %v131_v9 = vunpack.c.0.s8 %v130_v6  ;;  %2431 = vmatprep.subr.mxu0 %v88_v11  ;;  %2438 = vmatprep.subr.mxu1 %v2890_v3  ;;  %v2288_v49 = vld [vmem:[%s3310_s3] ss:$0 sm:$0xff]  ;;  %s2893_s3 = smov 32  }
  0x36   :  { %v2973_v8 = vsub.s32 %v100_v7, %v102_v4  ;;  %2432 = vmatpush3.msra.mxu0 %v88_v11  ;;  %2439 = vmatpush3.msra.mxu1 %v2985_v17 }
  0x37   :  { %v134_v20 = vsub.s32 %v131_v9, %v102_v4  ;;  %2440 = vmatprep.subr.mxu1 %v2890_v3  ;;  %2447 = vmatprep.subr.mxu0 %v2890_v3 }
  0x38   :  { %v104_v15 = vrot.slane %v95_v12, %v2973_v8  ;;  %v119_v19 = vrot.slane %v96_v13, %v2973_v8  ;;  %v111_v21 = vrot.slane %v97_v14, %v2973_v8  ;;  %v126_v23 = vrot.slane %v112_v18, %v2973_v8  ;;  %2441 = vmatpush3.msra.mxu1 %v2995_v22 }
  0x39   :  { %2442 = vmatprep.subr.mxu1 %v2890_v3 }
  0x3a   :  { %v127_v24 = vcombine.low %v104_v15, %v119_v19  ;;  %v128_v25 = vcombine.high %v104_v15, %v119_v19  ;;  %v143_v29 = vcombine.low %v111_v21, %v126_v23  ;;  %v144_v30 = vcombine.high %v111_v21, %v126_v23  ;;  %2443 = vmatpush3.msra.mxu1 %v3003_v26 }
  0x3b   :  { %2445 = vmatmul.mubr.f32.vlgmr.msra.gmra.mxu1 %v2890_v3  ;;  %2458 = vmatprep.subr.mxu1 %v2890_v3 }
  0x3c   :  { %v135_v27 = vrot.slane %v127_v24, %v134_v20  ;;  %v142_v28 = vrot.slane %v128_v25, %v134_v20  ;;  %v151_v33 = vrot.slane %v143_v29, %v134_v20  ;;  %v158_v34 = vrot.slane %v144_v30, %v134_v20  ;;  %2459 = vmatpush3.msra.mxu1 %v2980_v16 }
  0x3d   :  { %2460 = vmatprep.subr.mxu1 %v2890_v3  ;;  %2466 = vmatprep.mubr.msk.f32.mxu1 %vm2892_vm0, %v2890_v3 }
  0x3e   :  { %v159_v31 = vcombine.high %v135_v27, %v2890_v3  ;;  %v160_v32 = vcombine.high %v142_v28, %v2890_v3  ;;  %v161_v37 = vcombine.high %v151_v33, %v2890_v3  ;;  %v162_v38 = vcombine.high %v158_v34, %v2890_v3  ;;  %2461 = vmatpush3.msra.mxu1 %v2985_v17 }
  0x3f   :  { %2462 = vmatprep.subr.mxu1 %v2890_v3 }
  0x40   :  { %v177_v35 = vcombine.low %v135_v27, %v159_v31  ;;  %v178_v36 = vcombine.low %v142_v28, %v160_v32  ;;  %v194_v41 = vcombine.low %v151_v33, %v161_v37  ;;  %v195_v42 = vcombine.low %v158_v34, %v162_v38  ;;  %2463 = vmatpush3.msra.mxu1 %v2995_v22 }
  0x41   :  { %2464 = vmatprep.subr.mxu1 %v2890_v3 }
  0x42   :  { %v185_v39 = vrot.slane %v177_v35, %v2973_v8  ;;  %v192_v40 = vrot.slane %v178_v36, %v2973_v8  ;;  %v202_v44 = vrot.slane %v194_v41, %v2973_v8  ;;  %v209_v45 = vrot.slane %v195_v42, %v2973_v8  ;;  %2465 = vmatpush3.msra.mxu1 %v3003_v26 }
  0x43   :  { %2480 = vmatprep.subr.mxu1 %v2890_v3 }
  0x44   :  { %v193_v43 = vcombine.low %v185_v39, %v192_v40  ;;  %v210_v46 = vcombine.low %v202_v44, %v209_v45 }
  0x46   :  { %2433 = vmatprep.mubr.msk.f32.mxu0 %vm211_vm1, %v193_v43 }
  0x47   :  { %2434 = vmatmul.mubr.msk.f32.vlgmr.msra.gmra.mxu0 %vm211_vm1, %v210_v46 }
  0x48   :  { %2448 = vmatpush3.msra.mxu0 %v2980_v16  ;;  %2455 = vmatprep.mubr.msk.f32.mxu0 %vm2892_vm0, %v2890_v3 }
  0x49   :  { %2449 = vmatprep.subr.mxu0 %v2890_v3 }
  0x4a   :  { %2450 = vmatpush3.msra.mxu0 %v2985_v17 }
  0x4b   :  { %2451 = vmatprep.subr.mxu0 %v2890_v3 }
  0x4c   :  { %2452 = vmatpush3.msra.mxu0 %v2995_v22 }
  0x4d   :  { %2453 = vmatprep.subr.mxu0 %v2890_v3 }
  0x4e   :  { %2454 = vmatpush3.msra.mxu0 %v3003_v26 }
  0x4f   :  { %2469 = vmatprep.subr.mxu0 %v2890_v3 }
  0xfb   :  { %v414_v47 = vpop.f32.mrf.mxu1 }
  0xfd   :  { %v2446_v48 = vpop.f32.mrf.mxu1 }
 0x107   :  { %v2435_v50 = vpop.f32.mrf.mxu0 }
 0x108   :  { %v288_v51 = vadd.f32 %v2435_v50, %v2288_v49 }
 0x109   :  { %v282_v52 = vpop.f32.mrf.mxu0 }
 0x10a   :  { %v310_v53 = vcombine.high %v288_v51, %v288_v51  ;;  %v317_v54 = vrot.slane %v288_v51, %v2973_v8  ;;  %2293 = vst.sshfl [vmem:[#allocation2 + $0x8] sm:$0x3 pattern:$0x76325410] %v288_v51  ;;  %v283_v55 = vadd.f32 %v2288_v49, %v282_v52 }
 0x10c   :  { %v324_v56 = vrot.slane %v310_v53, %v2973_v8  ;;  %v325_v57 = vcombine.high %v317_v54, %v317_v54  ;;  %2294 = vst.sshfl [vmem:[#allocation2 + $0xc] sm:$0x3 pattern:$0x76325410] %v310_v53  ;;  %v293_v58 = vcombine.high %v283_v55, %v283_v55  ;;  %v300_v59 = vrot.slane %v283_v55, %v2973_v8 }
 0x10d   :  { %2291 = vst.sshfl [vmem:[#allocation2] sm:$0x3 pattern:$0x76325410] %v283_v55 }
 0x10e   :  { %v326_v60 = vcombine.high %v324_v56, %v324_v56  ;;  %340 = vst [vmem:[#allocation2 + $0xa] sm:$0x3] %v325_v57  ;;  %v307_v61 = vrot.slane %v293_v58, %v2973_v8  ;;  %v308_v62 = vcombine.high %v300_v59, %v300_v59  ;;  %2292 = vst.sshfl [vmem:[#allocation2 + $0x4] sm:$0x3 pattern:$0x76325410] %v293_v58 }
 0x110   :  { %342 = vst [vmem:[#allocation2 + $0xe] sm:$0x3] %v326_v60  ;;  %v309_v63 = vcombine.high %v307_v61, %v307_v61  ;;  %336 = vst [vmem:[#allocation2 + $0x2] sm:$0x3] %v308_v62 }
 0x112   :  { %338 = vst [vmem:[#allocation2 + $0x6] sm:$0x3] %v309_v63 }
 0x114   :  { %v343_v0 = vld [vmem:[#allocation2] sm:$0x3] }
 0x115   :  { %v418_v1 = vadd.f32 %v414_v47, %v343_v0  ;;  %v555_v40 = vld [vmem:[#allocation2 + $0x4] sm:$0x3] }
 0x117   :  { %2647 = vtanh.f32 %v418_v1  ;;  %v2295_v4 = vmul.f32 -1.442695, %v418_v1  ;;  %v450_v20 = vld [vmem:[#allocation2 + $0x2] sm:$0x3] }
 0x119   :  { %2649 = vpow2.f32 %v2295_v4  ;;  %v660_v58 = vld [vmem:[#allocation2 + $0x6] sm:$0x3] }
 0x124   :  { %v2648_v2 = vpop.eup %2647 }
 0x125   :  { %428 = vrot.lane.b32.xlu0 %v2648_v2, %s2893_s3 }
 0x126   :  { %v2650_v5 = vpop.eup %2649 }
 0x127   :  { %v422_v6 = vadd.f32 1.0, %v2650_v5 }
 0x129   :  { %2651 = vrcp.f32 %v422_v6 }
 0x136   :  { %v2652_v7 = vpop.eup %2651 }
 0x137   :  { %v426_v11 = vmul.f32 0.0, %v2652_v7 }
 0x197   :  { %v429_v9 = vpop.permute.xlu0 %428 }
 0x198   :  { %v431_v10 = vmul.f32 %v2652_v7, %v429_v9 }
 0x19a   :  { %433 = vrot.lane.b32.xlu0 %v431_v10, %s2893_s3 }
 0x20c   :  { %v434_v12 = vpop.permute.xlu0 %433 }
 0x20d   :  { %v436_v13 = vadd.f32 %v434_v12, %v426_v11 }
 0x20f   :  { %2653 = vtanh.f32 %v436_v13 }
 0x21c   :  { %v2654_v14 = vpop.eup %2653 }
 0x21d   :  { %439 = vrot.lane.b32.xlu1 %v2654_v14, %s2893_s3  ;;  %v765_v14 = vld [vmem:[#allocation2 + $0x8] sm:$0x3] }
 0x28f   :  { %v440_v15 = vpop.permute.xlu1 %439 }
 0x290   :  { %v442_v18 = vmul.f32 %v2652_v7, %v440_v15 }
 0x292   :  { %444 = vrot.lane.b32.xlu1 %v442_v18, %s2894_s15 }
 0x304   :  { %v445_v19 = vpop.permute.xlu1 %444 }
 0x305   :  { %448 = vst.msk [vmem:[#allocation3] sm:$0x3] %vm447_vm2, %v445_v19  ;;  %2456 = vmatmul.mubr.msk.f32.vlgmr.msra.gmra.mxu0 %vm344_vm3, %v445_v19 }
 0x306   :  { %2470 = vmatpush3.msra.mxu0 %v2980_v16  ;;  %2477 = vmatprep.mubr.msk.f32.mxu0 %vm2892_vm0, %v2890_v3 }
 0x307   :  { %2471 = vmatprep.subr.mxu0 %v2890_v3 }
 0x308   :  { %2472 = vmatpush3.msra.mxu0 %v2985_v17 }
 0x309   :  { %2473 = vmatprep.subr.mxu0 %v2890_v3 }
 0x30a   :  { %2474 = vmatpush3.msra.mxu0 %v2995_v22 }
 0x30b   :  { %2475 = vmatprep.subr.mxu0 %v2890_v3 }
 0x30c   :  { %2476 = vmatpush3.msra.mxu0 %v3003_v26 }
 0x30d   :  { %2491 = vmatprep.subr.mxu0 %v2890_v3 }
 0x3c5   :  { %v519_v21 = vpop.f32.mrf.mxu0 }
 0x3c6   :  { %v523_v23 = vadd.f32 %v519_v21, %v450_v20 }
 0x3c7   :  { %v2457_v24 = vpop.f32.mrf.mxu0 }
 0x3c8   :  { %2655 = vtanh.f32 %v523_v23  ;;  %v2297_v27 = vmul.f32 -1.442695, %v523_v23 }
 0x3ca   :  { %2657 = vpow2.f32 %v2297_v27 }
 0x3d5   :  { %v2656_v25 = vpop.eup %2655 }
 0x3d6   :  { %533 = vrot.lane.b32.xlu0 %v2656_v25, %s2893_s3 }
 0x3d7   :  { %v2658_v28 = vpop.eup %2657 }
 0x3d8   :  { %v527_v29 = vadd.f32 1.0, %v2658_v28 }
 0x3da   :  { %2659 = vrcp.f32 %v527_v29 }
 0x3e7   :  { %v2660_v30 = vpop.eup %2659 }
 0x3e8   :  { %v531_v33 = vmul.f32 %v2660_v30, %v436_v13 }
 0x448   :  { %v534_v31 = vpop.permute.xlu0 %533 }
 0x449   :  { %v536_v32 = vmul.f32 %v2660_v30, %v534_v31 }
 0x44b   :  { %538 = vrot.lane.b32.xlu1 %v536_v32, %s2893_s3 }
 0x4bd   :  { %v539_v34 = vpop.permute.xlu1 %538 }
 0x4be   :  { %v541_v35 = vadd.f32 %v539_v34, %v531_v33 }
 0x4c0   :  { %2661 = vtanh.f32 %v541_v35 }
 0x4cd   :  { %v2662_v36 = vpop.eup %2661 }
 0x4ce   :  { %544 = vrot.lane.b32.xlu0 %v2662_v36, %s2893_s3  ;;  %v870_v36 = vld [vmem:[#allocation2 + $0xa] sm:$0x3] }
 0x540   :  { %v545_v37 = vpop.permute.xlu0 %544 }
 0x541   :  { %v547_v38 = vmul.f32 %v2660_v30, %v545_v37 }
 0x543   :  { %549 = vrot.lane.b32.xlu1 %v547_v38, %s2894_s15 }
 0x5b5   :  { %v550_v39 = vpop.permute.xlu1 %549 }
 0x5b6   :  { %553 = vst.msk [vmem:[#allocation3 + $0x2] sm:$0x3] %vm447_vm2, %v550_v39  ;;  %2467 = vmatmul.mubr.msk.f32.vlgmr.msra.gmra.mxu1 %vm344_vm3, %v550_v39 }
 0x5b7   :  { %2481 = vmatpush3.msra.mxu1 %v2980_v16  ;;  %2488 = vmatprep.mubr.msk.f32.mxu1 %vm2892_vm0, %v2890_v3 }
 0x5b8   :  { %2482 = vmatprep.subr.mxu1 %v2890_v3 }
 0x5b9   :  { %2483 = vmatpush3.msra.mxu1 %v2985_v17 }
 0x5ba   :  { %2484 = vmatprep.subr.mxu1 %v2890_v3 }
 0x5bb   :  { %2485 = vmatpush3.msra.mxu1 %v2995_v22 }
 0x5bc   :  { %2486 = vmatprep.subr.mxu1 %v2890_v3 }
 0x5bd   :  { %2487 = vmatpush3.msra.mxu1 %v3003_v26 }
 0x5be   :  { %2502 = vmatprep.subr.mxu1 %v2890_v3 }
 0x676   :  { %v624_v41 = vpop.f32.mrf.mxu1 }
 0x677   :  { %v628_v42 = vadd.f32 %v624_v41, %v555_v40 }
 0x678   :  { %v2468_v43 = vpop.f32.mrf.mxu1 }
 0x679   :  { %2663 = vtanh.f32 %v628_v42  ;;  %v2299_v45 = vmul.f32 -1.442695, %v628_v42 }
 0x67b   :  { %2665 = vpow2.f32 %v2299_v45 }
 0x686   :  { %v2664_v44 = vpop.eup %2663 }
 0x687   :  { %638 = vrot.lane.b32.xlu0 %v2664_v44, %s2893_s3 }
 0x688   :  { %v2666_v46 = vpop.eup %2665 }
 0x689   :  { %v632_v47 = vadd.f32 1.0, %v2666_v46 }
 0x68b   :  { %2667 = vrcp.f32 %v632_v47 }
 0x698   :  { %v2668_v48 = vpop.eup %2667 }
 0x699   :  { %v636_v51 = vmul.f32 %v2668_v48, %v541_v35 }
 0x6f9   :  { %v639_v49 = vpop.permute.xlu0 %638 }
 0x6fa   :  { %v641_v50 = vmul.f32 %v2668_v48, %v639_v49 }
 0x6fc   :  { %643 = vrot.lane.b32.xlu1 %v641_v50, %s2893_s3  ;;  %v1194_v50 = vld [vmem:[#allocation3 + $0x2] sm:$0x3] }
 0x76e   :  { %v644_v52 = vpop.permute.xlu1 %643 }
 0x76f   :  { %v646_v53 = vadd.f32 %v644_v52, %v636_v51 }
 0x771   :  { %2669 = vtanh.f32 %v646_v53 }
 0x77e   :  { %v2670_v54 = vpop.eup %2669 }
 0x77f   :  { %649 = vrot.lane.b32.xlu0 %v2670_v54, %s2893_s3 }
 0x7f1   :  { %v650_v55 = vpop.permute.xlu0 %649 }
 0x7f2   :  { %v652_v56 = vmul.f32 %v2668_v48, %v650_v55 }
 0x7f4   :  { %654 = vrot.lane.b32.xlu1 %v652_v56, %s2894_s15 }
 0x866   :  { %v655_v57 = vpop.permute.xlu1 %654 }
 0x867   :  { %658 = vst.msk [vmem:[#allocation3 + $0x4] sm:$0x3] %vm447_vm2, %v655_v57  ;;  %2478 = vmatmul.mubr.msk.f32.vlgmr.msra.gmra.mxu0 %vm344_vm3, %v655_v57 }
 0x868   :  { %2492 = vmatpush3.msra.mxu0 %v2980_v16  ;;  %2499 = vmatprep.mubr.msk.f32.mxu0 %vm2892_vm0, %v2890_v3 }
 0x869   :  { %2493 = vmatprep.subr.mxu0 %v2890_v3 }
 0x86a   :  { %2494 = vmatpush3.msra.mxu0 %v2985_v17 }
 0x86b   :  { %2495 = vmatprep.subr.mxu0 %v2890_v3 }
 0x86c   :  { %2496 = vmatpush3.msra.mxu0 %v2995_v22 }
 0x86d   :  { %2497 = vmatprep.subr.mxu0 %v2890_v3 }
 0x86e   :  { %2498 = vmatpush3.msra.mxu0 %v3003_v26  ;;  %v1195_v51 = vld [vmem:[#allocation3 + $0x4] sm:$0x3] }
 0x86f   :  { %2513 = vmatprep.subr.mxu0 %v2890_v3 }
 0x927   :  { %v729_v59 = vpop.f32.mrf.mxu0 }
 0x928   :  { %v733_v60 = vadd.f32 %v729_v59, %v660_v58  ;;  %v975_v59 = vld [vmem:[#allocation2 + $0xc] sm:$0x3] }
 0x929   :  { %v2479_v61 = vpop.f32.mrf.mxu0 }
 0x92a   :  { %2671 = vtanh.f32 %v733_v60  ;;  %v2301_v63 = vmul.f32 -1.442695, %v733_v60 }
 0x92c   :  { %2673 = vpow2.f32 %v2301_v63 }
 0x937   :  { %v2672_v62 = vpop.eup %2671 }
 0x938   :  { %743 = vrot.lane.b32.xlu0 %v2672_v62, %s2893_s3 }
 0x939   :  { %v2674_v0 = vpop.eup %2673 }
 0x93a   :  { %v737_v1 = vadd.f32 1.0, %v2674_v0 }
 0x93c   :  { %2675 = vrcp.f32 %v737_v1 }
 0x949   :  { %v2676_v2 = vpop.eup %2675 }
 0x94a   :  { %v741_v6 = vmul.f32 %v2676_v2, %v646_v53  ;;  %v1193_v53 = vld [vmem:[#allocation3] sm:$0x3] }
 0x94b   :  { %v1215_v54 = vcombine.low %v1193_v53, %v1194_v50 }
 0x94d   :  { %v1223_v56 = vrot.slane %v1215_v54, %v2973_v8 }
 0x9aa   :  { %v744_v4 = vpop.permute.xlu0 %743 }
 0x9ab   :  { %v746_v5 = vmul.f32 %v2676_v2, %v744_v4 }
 0x9ad   :  { %748 = vrot.lane.b32.xlu1 %v746_v5, %s2893_s3 }
 0xa1f   :  { %v749_v7 = vpop.permute.xlu1 %748 }
 0xa20   :  { %v751_v9 = vadd.f32 %v749_v7, %v741_v6 }
 0xa22   :  { %2677 = vtanh.f32 %v751_v9 }
 0xa2f   :  { %v2678_v10 = vpop.eup %2677 }
 0xa30   :  { %754 = vrot.lane.b32.xlu0 %v2678_v10, %s2893_s3 }
 0xaa2   :  { %v755_v11 = vpop.permute.xlu0 %754 }
 0xaa3   :  { %v757_v12 = vmul.f32 %v2676_v2, %v755_v11 }
 0xaa5   :  { %759 = vrot.lane.b32.xlu1 %v757_v12, %s2894_s15 }
 0xb17   :  { %v760_v13 = vpop.permute.xlu1 %759 }
 0xb18   :  { %763 = vst.msk [vmem:[#allocation3 + $0x6] sm:$0x3] %vm447_vm2, %v760_v13  ;;  %2489 = vmatmul.mubr.msk.f32.vlgmr.msra.gmra.mxu1 %vm344_vm3, %v760_v13 }
 0xb19   :  { %2503 = vmatpush3.msra.mxu1 %v2980_v16  ;;  %2510 = vmatprep.mubr.msk.f32.mxu1 %vm2892_vm0, %v2890_v3 }
 0xb1a   :  { %2504 = vmatprep.subr.mxu1 %v2890_v3 }
 0xb1b   :  { %2505 = vmatpush3.msra.mxu1 %v2985_v17 }
 0xb1c   :  { %2506 = vmatprep.subr.mxu1 %v2890_v3 }
 0xb1d   :  { %2507 = vmatpush3.msra.mxu1 %v2995_v22 }
 0xb1e   :  { %2508 = vmatprep.subr.mxu1 %v2890_v3 }
 0xb1f   :  { %2509 = vmatpush3.msra.mxu1 %v3003_v26  ;;  %v1196_v49 = vld [vmem:[#allocation3 + $0x6] sm:$0x3] }
 0xb20   :  { %v1216_v52 = vcombine.low %v1195_v51, %v1196_v49 }
 0xb22   :  { %v1230_v55 = vrot.slane %v1216_v52, %v2973_v8  ;;  %v2310_v52 = vld [vmem:[%s3313_s6] ss:$0 sm:$0xff] }
 0xb24   :  { %v1231_v58 = vcombine.low %v1223_v56, %v1230_v55 }
 0xbd8   :  { %v834_v15 = vpop.f32.mrf.mxu1 }
 0xbd9   :  { %v838_v18 = vadd.f32 %v834_v15, %v765_v14  ;;  %v1080_v15 = vld [vmem:[#allocation2 + $0xe] sm:$0x3] }
 0xbda   :  { %v2490_v19 = vpop.f32.mrf.mxu1 }
 0xbdb   :  { %2679 = vtanh.f32 %v838_v18  ;;  %v2303_v21 = vmul.f32 -1.442695, %v838_v18 }
 0xbdd   :  { %2681 = vpow2.f32 %v2303_v21 }
 0xbe8   :  { %v2680_v20 = vpop.eup %2679 }
 0xbe9   :  { %848 = vrot.lane.b32.xlu0 %v2680_v20, %s2893_s3 }
 0xbea   :  { %v2682_v23 = vpop.eup %2681 }
 0xbeb   :  { %v842_v24 = vadd.f32 1.0, %v2682_v23 }
 0xbed   :  { %2683 = vrcp.f32 %v842_v24 }
 0xbfa   :  { %v2684_v25 = vpop.eup %2683 }
 0xbfb   :  { %v846_v29 = vmul.f32 %v2684_v25, %v751_v9 }
 0xc5b   :  { %v849_v27 = vpop.permute.xlu0 %848 }
 0xc5c   :  { %v851_v28 = vmul.f32 %v2684_v25, %v849_v27 }
 0xc5e   :  { %853 = vrot.lane.b32.xlu1 %v851_v28, %s2893_s3 }
 0xcd0   :  { %v854_v30 = vpop.permute.xlu1 %853 }
 0xcd1   :  { %v856_v31 = vadd.f32 %v854_v30, %v846_v29 }
 0xcd3   :  { %2685 = vtanh.f32 %v856_v31 }
 0xce0   :  { %v2686_v32 = vpop.eup %2685 }
 0xce1   :  { %859 = vrot.lane.b32.xlu0 %v2686_v32, %s2893_s3 }
 0xd53   :  { %v860_v33 = vpop.permute.xlu0 %859 }
 0xd54   :  { %v862_v34 = vmul.f32 %v2684_v25, %v860_v33 }
 0xd56   :  { %864 = vrot.lane.b32.xlu1 %v862_v34, %s2894_s15  ;;  %v1187_v34 = vld [vmem:[#allocation9 + $0x18] sm:$0xff] }
 0xd57   :  { %2524 = vmatprep.subr.mxu1 %v1187_v34 }
 0xdc8   :  { %v865_v35 = vpop.permute.xlu1 %864 }
 0xdc9   :  { %868 = vst.msk [vmem:[#allocation3 + $0x8] sm:$0x3] %vm447_vm2, %v865_v35  ;;  %2500 = vmatmul.mubr.msk.f32.vlgmr.msra.gmra.mxu0 %vm344_vm3, %v865_v35  ;;  %v1186_v35 = vld [vmem:[#allocation9 + $0x10] sm:$0xff] }
 0xdca   :  { %2514 = vmatpush3.msra.mxu0 %v2980_v16  ;;  %2521 = vmatprep.mubr.msk.f32.mxu0 %vm2892_vm0, %v2890_v3 }
 0xdcb   :  { %2515 = vmatprep.subr.mxu0 %v2890_v3 }
 0xdcc   :  { %2516 = vmatpush3.msra.mxu0 %v2985_v17 }
 0xdcd   :  { %2517 = vmatprep.subr.mxu0 %v2890_v3 }
 0xdce   :  { %2518 = vmatpush3.msra.mxu0 %v2995_v22 }
 0xdcf   :  { %2519 = vmatprep.subr.mxu0 %v2890_v3 }
 0xdd0   :  { %2520 = vmatpush3.msra.mxu0 %v3003_v26 }
 0xdd1   :  { %2535 = vmatprep.subr.mxu0 %v2890_v3 }
 0xe89   :  { %v939_v37 = vpop.f32.mrf.mxu0 }
 0xe8a   :  { %v943_v16 = vadd.f32 %v939_v37, %v870_v36  ;;  %v1185_v36 = vld [vmem:[#allocation9 + $0x8] sm:$0xff]  ;;  %v1184_v37 = vld [vmem:[#allocation9] sm:$0xff] }
 0xe8b   :  { %v2501_v38 = vpop.f32.mrf.mxu0 }
 0xe8c   :  { %2687 = vtanh.f32 %v943_v16  ;;  %v2305_v40 = vmul.f32 -1.442695, %v943_v16 }
 0xe8e   :  { %2689 = vpow2.f32 %v2305_v40  ;;  %v3149_v40 = vld [vmem:[#allocation10 + $0x10] sm:$0xff] }
 0xe99   :  { %v2688_v39 = vpop.eup %2687 }
 0xe9a   :  { %953 = vrot.lane.b32.xlu0 %v2688_v39, %s2893_s3  ;;  %v3147_v39 = vld [vmem:[#allocation10 + $0x18] sm:$0xff] }
 0xe9b   :  { %v2690_v17 = vpop.eup %2689 }
 0xe9c   :  { %v947_v41 = vadd.f32 1.0, %v2690_v17  ;;  %v3153_v17 = vld [vmem:[#allocation10 + $0x8] sm:$0xff] }
 0xe9e   :  { %2691 = vrcp.f32 %v947_v41  ;;  %v3157_v41 = vld [vmem:[#allocation10] sm:$0xff] }
 0xeab   :  { %v2692_v22 = vpop.eup %2691 }
 0xeac   :  { %v951_v26 = vmul.f32 %v2692_v22, %v856_v31 }
 0xf0c   :  { %v954_v42 = vpop.permute.xlu0 %953 }
 0xf0d   :  { %v956_v43 = vmul.f32 %v2692_v22, %v954_v42 }
 0xf0f   :  { %958 = vrot.lane.b32.xlu1 %v956_v43, %s2893_s3  ;;  %v1197_v43 = vld [vmem:[#allocation3 + $0x8] sm:$0x3] }
 0xf81   :  { %v959_v44 = vpop.permute.xlu1 %958 }
 0xf82   :  { %v961_v45 = vadd.f32 %v959_v44, %v951_v26 }
 0xf84   :  { %2693 = vtanh.f32 %v961_v45 }
 0xf91   :  { %v2694_v46 = vpop.eup %2693 }
 0xf92   :  { %964 = vrot.lane.b32.xlu0 %v2694_v46, %s2893_s3 }
0x1004   :  { %v965_v47 = vpop.permute.xlu0 %964 }
0x1005   :  { %v967_v48 = vmul.f32 %v2692_v22, %v965_v47 }
0x1007   :  { %969 = vrot.lane.b32.xlu1 %v967_v48, %s2894_s15 }
0x1079   :  { %v970_v57 = vpop.permute.xlu1 %969 }
0x107a   :  { %973 = vst.msk [vmem:[#allocation3 + $0xa] sm:$0x3] %vm447_vm2, %v970_v57  ;;  %2511 = vmatmul.mubr.msk.f32.vlgmr.msra.gmra.mxu1 %vm344_vm3, %v970_v57 }
0x107b   :  { %2532 = vmatprep.mubr.msk.f32.mxu1 %vm344_vm3, %v1231_v58  ;;  %2525 = vmatpush3.msra.mxu1 %v1187_v34 }
0x107c   :  { %2526 = vmatprep.subr.mxu1 %v1186_v35 }
0x107d   :  { %2527 = vmatpush3.msra.mxu1 %v1186_v35 }
0x107e   :  { %2528 = vmatprep.subr.mxu1 %v1185_v36 }
0x107f   :  { %2529 = vmatpush3.msra.mxu1 %v1185_v36 }
0x1080   :  { %2530 = vmatprep.subr.mxu1 %v1184_v37 }
0x1081   :  { %2531 = vmatpush3.msra.mxu1 %v1184_v37  ;;  %v1198_v42 = vld [vmem:[#allocation3 + $0xa] sm:$0x3] }
0x1082   :  { %2546 = vmatprep.subr.mxu1 %v2890_v3  ;;  %v1232_v26 = vcombine.low %v1197_v43, %v1198_v42 }
0x1084   :  { %v1240_v47 = vrot.slane %v1232_v26, %v2973_v8 }
0x113a   :  { %v1044_v60 = vpop.f32.mrf.mxu1 }
0x113b   :  { %v1048_v61 = vadd.f32 %v1044_v60, %v975_v59 }
0x113c   :  { %v2512_v62 = vpop.f32.mrf.mxu1 }
0x113d   :  { %2695 = vtanh.f32 %v1048_v61  ;;  %v2307_v0 = vmul.f32 -1.442695, %v1048_v61 }
0x113f   :  { %2697 = vpow2.f32 %v2307_v0 }
0x114a   :  { %v2696_v63 = vpop.eup %2695 }
0x114b   :  { %1058 = vrot.lane.b32.xlu0 %v2696_v63, %s2893_s3 }
0x114c   :  { %v2698_v1 = vpop.eup %2697 }
0x114d   :  { %v1052_v2 = vadd.f32 1.0, %v2698_v1 }
0x114f   :  { %2699 = vrcp.f32 %v1052_v2 }
0x115c   :  { %v2700_v4 = vpop.eup %2699 }
0x115d   :  { %v1056_v7 = vmul.f32 %v2700_v4, %v961_v45 }
0x11bd   :  { %v1059_v5 = vpop.permute.xlu0 %1058 }
0x11be   :  { %v1061_v6 = vmul.f32 %v2700_v4, %v1059_v5 }
0x11c0   :  { %1063 = vrot.lane.b32.xlu1 %v1061_v6, %s2893_s3 }
0x1232   :  { %v1064_v9 = vpop.permute.xlu1 %1063 }
0x1233   :  { %v1066_v10 = vadd.f32 %v1064_v9, %v1056_v7 }
0x1235   :  { %2701 = vtanh.f32 %v1066_v10 }
0x1242   :  { %v2702_v11 = vpop.eup %2701 }
0x1243   :  { %1069 = vrot.lane.b32.xlu0 %v2702_v11, %s2893_s3 }
0x12b5   :  { %v1070_v12 = vpop.permute.xlu0 %1069 }
0x12b6   :  { %v1072_v13 = vmul.f32 %v2700_v4, %v1070_v12 }
0x12b8   :  { %1074 = vrot.lane.b32.xlu1 %v1072_v13, %s2894_s15 }
0x132a   :  { %v1075_v14 = vpop.permute.xlu1 %1074 }
0x132b   :  { %1078 = vst.msk [vmem:[#allocation3 + $0xc] sm:$0x3] %vm447_vm2, %v1075_v14  ;;  %2522 = vmatmul.mubr.msk.f32.vlgmr.msra.gmra.mxu0 %vm344_vm3, %v1075_v14 }
0x132c   :  { %2543 = vmatprep.mubr.msk.f32.mxu0 %vm2892_vm0, %v2890_v3  ;;  %2536 = vmatpush3.msra.mxu0 %v3147_v39 }
0x132d   :  { %2537 = vmatprep.subr.mxu0 %v2890_v3 }
0x132e   :  { %2538 = vmatpush3.msra.mxu0 %v3149_v40 }
0x132f   :  { %2539 = vmatprep.subr.mxu0 %v2890_v3 }
0x1330   :  { %2540 = vmatpush3.msra.mxu0 %v3153_v17 }
0x1331   :  { %2541 = vmatprep.subr.mxu0 %v2890_v3 }
0x1332   :  { %2542 = vmatpush3.msra.mxu0 %v3157_v41  ;;  %v1199_v44 = vld [vmem:[#allocation3 + $0xc] sm:$0x3] }
0x1333   :  { %2544 = vmatmul.mubr.f32.vlgmr.msra.gmra.mxu0 %v2890_v3  ;;  %2557 = vmatprep.subr.mxu0 %v2890_v3 }
0x1334   :  { %2558 = vmatpush3.msra.mxu0 %v3147_v39  ;;  %2565 = vmatprep.mubr.msk.f32.mxu0 %vm2892_vm0, %v2890_v3 }
0x1335   :  { %2559 = vmatprep.subr.mxu0 %v2890_v3 }
0x1336   :  { %2560 = vmatpush3.msra.mxu0 %v3149_v40 }
0x1337   :  { %2561 = vmatprep.subr.mxu0 %v2890_v3 }
0x1338   :  { %2562 = vmatpush3.msra.mxu0 %v3153_v17 }
0x1339   :  { %2563 = vmatprep.subr.mxu0 %v2890_v3 }
0x133a   :  { %2564 = vmatpush3.msra.mxu0 %v3157_v41 }
0x133b   :  { %2579 = vmatprep.subr.mxu0 %v2890_v3 }
0x13eb   :  { %v1149_v18 = vpop.f32.mrf.mxu0 }
0x13ec   :  { %v1153_v19 = vadd.f32 %v1149_v18, %v1080_v15 }
0x13ed   :  { %v2523_v20 = vpop.f32.mrf.mxu0 }
0x13ee   :  { %2703 = vtanh.f32 %v1153_v19  ;;  %v2309_v23 = vmul.f32 -1.442695, %v1153_v19 }
0x13f0   :  { %2705 = vpow2.f32 %v2309_v23 }
0x13f3   :  { %v1447_v50 = vpop.f32.mrf.mxu0 }
0x13f5   :  { %v2545_v51 = vpop.f32.mrf.mxu0 }
0x13fb   :  { %v2704_v21 = vpop.eup %2703 }
0x13fc   :  { %1163 = vrot.lane.b32.xlu0 %v2704_v21, %s2893_s3 }
0x13fd   :  { %v2706_v24 = vpop.eup %2705 }
0x13fe   :  { %v1157_v25 = vadd.f32 1.0, %v2706_v24 }
0x1400   :  { %2707 = vrcp.f32 %v1157_v25 }
0x140d   :  { %v2708_v27 = vpop.eup %2707 }
0x140e   :  { %v1161_v30 = vmul.f32 %v2708_v27, %v1066_v10 }
0x146e   :  { %v1164_v28 = vpop.permute.xlu0 %1163 }
0x146f   :  { %v1166_v29 = vmul.f32 %v2708_v27, %v1164_v28 }
0x1471   :  { %1168 = vrot.lane.b32.xlu1 %v1166_v29, %s2893_s3 }
0x14e3   :  { %v1169_v31 = vpop.permute.xlu1 %1168 }
0x14e4   :  { %v1171_v32 = vadd.f32 %v1169_v31, %v1161_v30 }
0x14e6   :  { %2709 = vtanh.f32 %v1171_v32 }
0x14f3   :  { %v2710_v33 = vpop.eup %2709 }
0x14f4   :  { %1174 = vrot.lane.b32.xlu0 %v2710_v33, %s2893_s3 }
0x1566   :  { %v1175_v16 = vpop.permute.xlu0 %1174 }
0x1567   :  { %v1177_v38 = vmul.f32 %v2708_v27, %v1175_v16 }
0x1569   :  { %1179 = vrot.lane.b32.xlu1 %v1177_v38, %s2894_s15 }
0x15db   :  { %v1180_v22 = vpop.permute.xlu1 %1179 }
0x15dc   :  { %1183 = vst.msk [vmem:[#allocation3 + $0xe] sm:$0x3] %vm447_vm2, %v1180_v22 }
0x15e3   :  { %v1200_v45 = vld [vmem:[#allocation3 + $0xe] sm:$0x3] }
0x15e4   :  { %v1233_v46 = vcombine.low %v1199_v44, %v1200_v45 }
0x15e6   :  { %v1247_v48 = vrot.slane %v1233_v46, %v2973_v8 }
0x15e8   :  { %v1248_v49 = vcombine.low %v1240_v47, %v1247_v48 }
0x15ea   :  { %2533 = vmatmul.mubr.msk.f32.vlgmr.msra.gmra.mxu1 %vm344_vm3, %v1248_v49 }
0x15eb   :  { %2547 = vmatpush3.msra.mxu1 %v3147_v39  ;;  %2554 = vmatprep.mubr.msk.f32.mxu1 %vm2892_vm0, %v2890_v3 }
0x15ec   :  { %2548 = vmatprep.subr.mxu1 %v2890_v3 }
0x15ed   :  { %2549 = vmatpush3.msra.mxu1 %v3149_v40 }
0x15ee   :  { %2550 = vmatprep.subr.mxu1 %v2890_v3 }
0x15ef   :  { %2551 = vmatpush3.msra.mxu1 %v3153_v17 }
0x15f0   :  { %2552 = vmatprep.subr.mxu1 %v2890_v3 }
0x15f1   :  { %2553 = vmatpush3.msra.mxu1 %v3157_v41 }
0x15f2   :  { %2568 = vmatprep.subr.mxu1 %v2890_v3 }
0x16aa   :  { %v2534_v53 = vpop.f32.mrf.mxu1 }
0x16ab   :  { %v1325_v54 = vadd.f32 %v2534_v53, %v2310_v52 }
0x16ac   :  { %v1319_v55 = vpop.f32.mrf.mxu1 }
0x16ad   :  { %v1347_v56 = vcombine.high %v1325_v54, %v1325_v54  ;;  %v1354_v57 = vrot.slane %v1325_v54, %v2973_v8  ;;  %2315 = vst.sshfl [vmem:[#allocation2 + $0x8] sm:$0x3 pattern:$0x76325410] %v1325_v54  ;;  %v1320_v58 = vadd.f32 %v2310_v52, %v1319_v55 }
0x16af   :  { %v1361_v59 = vrot.slane %v1347_v56, %v2973_v8  ;;  %v1362_v60 = vcombine.high %v1354_v57, %v1354_v57  ;;  %2316 = vst.sshfl [vmem:[#allocation2 + $0xc] sm:$0x3 pattern:$0x76325410] %v1347_v56  ;;  %v1330_v61 = vcombine.high %v1320_v58, %v1320_v58  ;;  %v1337_v62 = vrot.slane %v1320_v58, %v2973_v8 }
0x16b0   :  { %2313 = vst.sshfl [vmem:[#allocation2] sm:$0x3 pattern:$0x76325410] %v1320_v58 }
0x16b1   :  { %v1363_v63 = vcombine.high %v1361_v59, %v1361_v59  ;;  %1377 = vst [vmem:[#allocation2 + $0xa] sm:$0x3] %v1362_v60  ;;  %v1344_v0 = vrot.slane %v1330_v61, %v2973_v8  ;;  %v1345_v1 = vcombine.high %v1337_v62, %v1337_v62  ;;  %2314 = vst.sshfl [vmem:[#allocation2 + $0x4] sm:$0x3 pattern:$0x76325410] %v1330_v61 }
0x16b3   :  { %1379 = vst [vmem:[#allocation2 + $0xe] sm:$0x3] %v1363_v63  ;;  %v1346_v2 = vcombine.high %v1344_v0, %v1344_v0  ;;  %1373 = vst [vmem:[#allocation2 + $0x2] sm:$0x3] %v1345_v1 }
0x16b5   :  { %1375 = vst [vmem:[#allocation2 + $0x6] sm:$0x3] %v1346_v2 }
0x16b7   :  { %v1380_v4 = vld [vmem:[#allocation2] sm:$0x3] }
0x16b8   :  { %v1451_v5 = vadd.f32 %v1447_v50, %v1380_v4  ;;  %v1577_v43 = vld [vmem:[#allocation2 + $0x4] sm:$0x3] }
0x16ba   :  { %2711 = vtanh.f32 %v1451_v5  ;;  %v2317_v7 = vmul.f32 -1.442695, %v1451_v5  ;;  %v1476_v23 = vld [vmem:[#allocation2 + $0x2] sm:$0x3] }
0x16bc   :  { %2713 = vpow2.f32 %v2317_v7  ;;  %v1678_v60 = vld [vmem:[#allocation2 + $0x6] sm:$0x3] }
0x16c7   :  { %v2712_v6 = vpop.eup %2711 }
0x16c8   :  { %1461 = vrot.lane.b32.xlu0 %v2712_v6, %s2893_s3 }
0x16c9   :  { %v2714_v9 = vpop.eup %2713 }
0x16ca   :  { %v1455_v10 = vadd.f32 1.0, %v2714_v9 }
0x16cc   :  { %2715 = vrcp.f32 %v1455_v10 }
0x16d9   :  { %v2716_v11 = vpop.eup %2715 }
0x16da   :  { %v1459_v13 = vmul.f32 0.0, %v2716_v11 }
0x173a   :  { %v1462_v12 = vpop.permute.xlu0 %1461 }
0x173b   :  { %v1464_v8 = vmul.f32 %v2716_v11, %v1462_v12 }
0x173d   :  { %1466 = vrot.lane.b32.xlu1 %v1464_v8, %s2893_s3 }
0x17af   :  { %v1467_v14 = vpop.permute.xlu1 %1466 }
0x17b0   :  { %v1469_v15 = vadd.f32 %v1467_v14, %v1459_v13 }
0x17b2   :  { %2717 = vtanh.f32 %v1469_v15 }
0x17bf   :  { %v2718_v18 = vpop.eup %2717 }
0x17c0   :  { %1472 = vrot.lane.b32.xlu0 %v2718_v18, %s2893_s3 }
0x1832   :  { %v1473_v19 = vpop.permute.xlu0 %1472 }
0x1833   :  { %v1475_v20 = vmul.f32 %v2716_v11, %v1473_v19 }
0x1835   :  { %1478 = vrot.lane.b32.xlu1 %v1475_v20, %s2894_s15 }
0x18a7   :  { %v1479_v21 = vpop.permute.xlu1 %1478 }
0x18a8   :  { %2555 = vmatmul.mubr.msk.f32.vlgmr.msra.gmra.mxu1 %vm344_vm3, %v1479_v21 }
0x18a9   :  { %2569 = vmatpush3.msra.mxu1 %v3147_v39  ;;  %2576 = vmatprep.mubr.msk.f32.mxu1 %vm2892_vm0, %v2890_v3 }
0x18aa   :  { %2570 = vmatprep.subr.mxu1 %v2890_v3 }
0x18ab   :  { %2571 = vmatpush3.msra.mxu1 %v3149_v40 }
0x18ac   :  { %2572 = vmatprep.subr.mxu1 %v2890_v3 }
0x18ad   :  { %2573 = vmatpush3.msra.mxu1 %v3153_v17 }
0x18ae   :  { %2574 = vmatprep.subr.mxu1 %v2890_v3 }
0x18af   :  { %2575 = vmatpush3.msra.mxu1 %v3157_v41 }
0x18b0   :  { %2590 = vmatprep.subr.mxu1 %v2890_v3 }
0x1968   :  { %v1548_v24 = vpop.f32.mrf.mxu1 }
0x1969   :  { %v1552_v25 = vadd.f32 %v1548_v24, %v1476_v23 }
0x196a   :  { %v2556_v27 = vpop.f32.mrf.mxu1 }
0x196b   :  { %2719 = vtanh.f32 %v1552_v25  ;;  %v2319_v29 = vmul.f32 -1.442695, %v1552_v25 }
0x196d   :  { %2721 = vpow2.f32 %v2319_v29 }
0x1978   :  { %v2720_v28 = vpop.eup %2719 }
0x1979   :  { %1562 = vrot.lane.b32.xlu0 %v2720_v28, %s2893_s3 }
0x197a   :  { %v2722_v30 = vpop.eup %2721 }
0x197b   :  { %v1556_v31 = vadd.f32 1.0, %v2722_v30 }
0x197d   :  { %2723 = vrcp.f32 %v1556_v31 }
0x198a   :  { %v2724_v32 = vpop.eup %2723 }
0x198b   :  { %v1560_v35 = vmul.f32 %v2724_v32, %v1469_v15  ;;  %v1779_v15 = vld [vmem:[#allocation2 + $0x8] sm:$0x3] }
0x19eb   :  { %v1563_v33 = vpop.permute.xlu0 %1562 }
0x19ec   :  { %v1565_v34 = vmul.f32 %v2724_v32, %v1563_v33 }
0x19ee   :  { %1567 = vrot.lane.b32.xlu1 %v1565_v34, %s2893_s3 }
0x1a60   :  { %v1568_v36 = vpop.permute.xlu1 %1567 }
0x1a61   :  { %v1570_v37 = vadd.f32 %v1568_v36, %v1560_v35 }
0x1a63   :  { %2725 = vtanh.f32 %v1570_v37 }
0x1a70   :  { %v2726_v16 = vpop.eup %2725 }
0x1a71   :  { %1573 = vrot.lane.b32.xlu0 %v2726_v16, %s2893_s3 }
0x1ae3   :  { %v1574_v38 = vpop.permute.xlu0 %1573 }
0x1ae4   :  { %v1576_v22 = vmul.f32 %v2724_v32, %v1574_v38 }
0x1ae6   :  { %1579 = vrot.lane.b32.xlu1 %v1576_v22, %s2894_s15 }
0x1b58   :  { %v1580_v42 = vpop.permute.xlu1 %1579 }
0x1b59   :  { %2566 = vmatmul.mubr.msk.f32.vlgmr.msra.gmra.mxu0 %vm344_vm3, %v1580_v42 }
0x1b5a   :  { %2580 = vmatpush3.msra.mxu0 %v3147_v39  ;;  %2587 = vmatprep.mubr.msk.f32.mxu0 %vm2892_vm0, %v2890_v3 }
0x1b5b   :  { %2581 = vmatprep.subr.mxu0 %v2890_v3 }
0x1b5c   :  { %2582 = vmatpush3.msra.mxu0 %v3149_v40 }
0x1b5d   :  { %2583 = vmatprep.subr.mxu0 %v2890_v3 }
0x1b5e   :  { %2584 = vmatpush3.msra.mxu0 %v3153_v17 }
0x1b5f   :  { %2585 = vmatprep.subr.mxu0 %v2890_v3 }
0x1b60   :  { %2586 = vmatpush3.msra.mxu0 %v3157_v41 }
0x1b61   :  { %2601 = vmatprep.subr.mxu0 %v2890_v3 }
0x1c19   :  { %v1649_v26 = vpop.f32.mrf.mxu0 }
0x1c1a   :  { %v1653_v44 = vadd.f32 %v1649_v26, %v1577_v43 }
0x1c1b   :  { %v2567_v45 = vpop.f32.mrf.mxu0 }
0x1c1c   :  { %2727 = vtanh.f32 %v1653_v44  ;;  %v2321_v47 = vmul.f32 -1.442695, %v1653_v44 }
0x1c1e   :  { %2729 = vpow2.f32 %v2321_v47 }
0x1c29   :  { %v2728_v46 = vpop.eup %2727 }
0x1c2a   :  { %1663 = vrot.lane.b32.xlu0 %v2728_v46, %s2893_s3 }
0x1c2b   :  { %v2730_v48 = vpop.eup %2729 }
0x1c2c   :  { %v1657_v49 = vadd.f32 1.0, %v2730_v48 }
0x1c2e   :  { %2731 = vrcp.f32 %v1657_v49 }
0x1c3b   :  { %v2732_v50 = vpop.eup %2731 }
0x1c3c   :  { %v1661_v53 = vmul.f32 %v2732_v50, %v1570_v37  ;;  %v1880_v37 = vld [vmem:[#allocation2 + $0xa] sm:$0x3] }
0x1c9c   :  { %v1664_v51 = vpop.permute.xlu0 %1663 }
0x1c9d   :  { %v1666_v52 = vmul.f32 %v2732_v50, %v1664_v51  ;;  %v1981_v51 = vld [vmem:[#allocation2 + $0xc] sm:$0x3] }
0x1c9f   :  { %1668 = vrot.lane.b32.xlu1 %v1666_v52, %s2893_s3 }
0x1d11   :  { %v1669_v54 = vpop.permute.xlu1 %1668 }
0x1d12   :  { %v1671_v55 = vadd.f32 %v1669_v54, %v1661_v53 }
0x1d14   :  { %2733 = vtanh.f32 %v1671_v55 }
0x1d21   :  { %v2734_v56 = vpop.eup %2733 }
0x1d22   :  { %1674 = vrot.lane.b32.xlu0 %v2734_v56, %s2893_s3 }
0x1d94   :  { %v1675_v57 = vpop.permute.xlu0 %1674 }
0x1d95   :  { %v1677_v58 = vmul.f32 %v2732_v50, %v1675_v57 }
0x1d97   :  { %1680 = vrot.lane.b32.xlu1 %v1677_v58, %s2894_s15 }
0x1e09   :  { %v1681_v59 = vpop.permute.xlu1 %1680 }
0x1e0a   :  { %2577 = vmatmul.mubr.msk.f32.vlgmr.msra.gmra.mxu1 %vm344_vm3, %v1681_v59 }
0x1e0b   :  { %2591 = vmatpush3.msra.mxu1 %v3147_v39  ;;  %2598 = vmatprep.mubr.msk.f32.mxu1 %vm2892_vm0, %v2890_v3 }
0x1e0c   :  { %2592 = vmatprep.subr.mxu1 %v2890_v3 }
0x1e0d   :  { %2593 = vmatpush3.msra.mxu1 %v3149_v40 }
0x1e0e   :  { %2594 = vmatprep.subr.mxu1 %v2890_v3 }
0x1e0f   :  { %2595 = vmatpush3.msra.mxu1 %v3153_v17 }
0x1e10   :  { %2596 = vmatprep.subr.mxu1 %v2890_v3 }
0x1e11   :  { %2597 = vmatpush3.msra.mxu1 %v3157_v41 }
0x1e12   :  { %2612 = vmatprep.subr.mxu1 %v2890_v3 }
0x1eca   :  { %v1750_v61 = vpop.f32.mrf.mxu1 }
0x1ecb   :  { %v1754_v62 = vadd.f32 %v1750_v61, %v1678_v60 }
0x1ecc   :  { %v2578_v63 = vpop.f32.mrf.mxu1 }
0x1ecd   :  { %2735 = vtanh.f32 %v1754_v62  ;;  %v2323_v1 = vmul.f32 -1.442695, %v1754_v62 }
0x1ecf   :  { %2737 = vpow2.f32 %v2323_v1 }
0x1eda   :  { %v2736_v0 = vpop.eup %2735 }
0x1edb   :  { %1764 = vrot.lane.b32.xlu0 %v2736_v0, %s2893_s3 }
0x1edc   :  { %v2738_v2 = vpop.eup %2737 }
0x1edd   :  { %v1758_v4 = vadd.f32 1.0, %v2738_v2 }
0x1edf   :  { %2739 = vrcp.f32 %v1758_v4 }
0x1eec   :  { %v2740_v5 = vpop.eup %2739 }
0x1eed   :  { %v1762_v9 = vmul.f32 %v2740_v5, %v1671_v55 }
0x1f4d   :  { %v1765_v6 = vpop.permute.xlu0 %1764 }
0x1f4e   :  { %v1767_v7 = vmul.f32 %v2740_v5, %v1765_v6  ;;  %v2082_v6 = vld [vmem:[#allocation2 + $0xe] sm:$0x3] }
0x1f50   :  { %1769 = vrot.lane.b32.xlu1 %v1767_v7, %s2893_s3 }
0x1fc2   :  { %v1770_v10 = vpop.permute.xlu1 %1769 }
0x1fc3   :  { %v1772_v11 = vadd.f32 %v1770_v10, %v1762_v9 }
0x1fc5   :  { %2741 = vtanh.f32 %v1772_v11 }
0x1fd2   :  { %v2742_v12 = vpop.eup %2741 }
0x1fd3   :  { %1775 = vrot.lane.b32.xlu0 %v2742_v12, %s2893_s3 }
0x2045   :  { %v1776_v8 = vpop.permute.xlu0 %1775 }
0x2046   :  { %v1778_v13 = vmul.f32 %v2740_v5, %v1776_v8 }
0x2048   :  { %1781 = vrot.lane.b32.xlu1 %v1778_v13, %s2894_s15 }
0x20ba   :  { %v1782_v14 = vpop.permute.xlu1 %1781 }
0x20bb   :  { %2588 = vmatmul.mubr.msk.f32.vlgmr.msra.gmra.mxu0 %vm344_vm3, %v1782_v14 }
0x20bc   :  { %2602 = vmatpush3.msra.mxu0 %v3147_v39  ;;  %2609 = vmatprep.mubr.msk.f32.mxu0 %vm2892_vm0, %v2890_v3 }
0x20bd   :  { %2603 = vmatprep.subr.mxu0 %v2890_v3 }
0x20be   :  { %2604 = vmatpush3.msra.mxu0 %v3149_v40 }
0x20bf   :  { %2605 = vmatprep.subr.mxu0 %v2890_v3 }
0x20c0   :  { %2606 = vmatpush3.msra.mxu0 %v3153_v17 }
0x20c1   :  { %2607 = vmatprep.subr.mxu0 %v2890_v3 }
0x20c2   :  { %2608 = vmatpush3.msra.mxu0 %v3157_v41 }
0x20c3   :  { %2623 = vmatprep.subr.mxu0 %v2890_v3 }
0x217b   :  { %v1851_v18 = vpop.f32.mrf.mxu0 }
0x217c   :  { %v1855_v19 = vadd.f32 %v1851_v18, %v1779_v15 }
0x217d   :  { %v2589_v20 = vpop.f32.mrf.mxu0 }
0x217e   :  { %2743 = vtanh.f32 %v1855_v19  ;;  %v2325_v23 = vmul.f32 -1.442695, %v1855_v19 }
0x2180   :  { %2745 = vpow2.f32 %v2325_v23  ;;  %v2186_v23 = vld [vmem:[%s3314_s7 + $0x18] sm:$0xff] }
0x218b   :  { %v2744_v21 = vpop.eup %2743 }
0x218c   :  { %1865 = vrot.lane.b32.xlu0 %v2744_v21, %s2893_s3 }
0x218d   :  { %v2746_v24 = vpop.eup %2745 }
0x218e   :  { %v1859_v25 = vadd.f32 1.0, %v2746_v24  ;;  %v2185_v24 = vld [vmem:[%s3314_s7 + $0x10] sm:$0xff] }
0x2190   :  { %2747 = vrcp.f32 %v1859_v25  ;;  %v2184_v25 = vld [vmem:[%s3314_s7 + $0x8] sm:$0xff] }
0x219d   :  { %v2748_v27 = vpop.eup %2747 }
0x219e   :  { %v1863_v30 = vmul.f32 %v2748_v27, %v1772_v11 }
0x21fe   :  { %v1866_v28 = vpop.permute.xlu0 %1865 }
0x21ff   :  { %v1868_v29 = vmul.f32 %v2748_v27, %v1866_v28 }
0x2201   :  { %1870 = vrot.lane.b32.xlu1 %v1868_v29, %s2893_s3 }
0x2273   :  { %v1871_v31 = vpop.permute.xlu1 %1870 }
0x2274   :  { %v1873_v32 = vadd.f32 %v1871_v31, %v1863_v30 }
0x2276   :  { %2749 = vtanh.f32 %v1873_v32 }
0x2283   :  { %v2750_v33 = vpop.eup %2749 }
0x2284   :  { %1876 = vrot.lane.b32.xlu0 %v2750_v33, %s2893_s3 }
0x22f6   :  { %v1877_v34 = vpop.permute.xlu0 %1876 }
0x22f7   :  { %v1879_v35 = vmul.f32 %v2748_v27, %v1877_v34  ;;  %v2183_v27 = vld [vmem:[%s3314_s7] sm:$0xff]  ;;  %s2277_s7 = sshll.u32 %s2895_s26, 4  ;;  %s2278_s7 = int_to_ptr.vmem [resolvable:$true] %s2277_s7 }
0x22f8   :  { %s2855_s0 = scalar_lea.vmem %s2278_s7, 32  ;;  %p2860_p7 = scmp.lt.s32.totalorder %s2278_s7, %s2278_s7 }
0x22f9   :  { %1882 = vrot.lane.b32.xlu1 %v1879_v35, %s2894_s15  ;;  %p2856_p6 = scmp.ne.s32.totalorder %s2278_s7, %s2855_s0  ;;  %p2861_p8 = scmp.lt.s32.totalorder %s2855_s0, %s2855_s0 }
0x22fb   :  { %p2862_p9 = por %p2861_p8, %p2860_p7 }
0x22fd   :  { %p2863_p10 = pnand %p2862_p9, %p2856_p6 }
0x236b   :  { %v1883_v36 = vpop.permute.xlu1 %1882 }
0x236c   :  { %2599 = vmatmul.mubr.msk.f32.vlgmr.msra.gmra.mxu1 %vm344_vm3, %v1883_v36 }
0x236d   :  { %2613 = vmatpush3.msra.mxu1 %v3147_v39  ;;  %2620 = vmatprep.mubr.msk.f32.mxu1 %vm2892_vm0, %v2890_v3 }
0x236e   :  { %2614 = vmatprep.subr.mxu1 %v2890_v3 }
0x236f   :  { %2615 = vmatpush3.msra.mxu1 %v3149_v40 }
0x2370   :  { %2616 = vmatprep.subr.mxu1 %v2890_v3 }
0x2371   :  { %2617 = vmatpush3.msra.mxu1 %v3153_v17 }
0x2372   :  { %2618 = vmatprep.subr.mxu1 %v2890_v3 }
0x2373   :  { %2619 = vmatpush3.msra.mxu1 %v3157_v41 }
0x242c   :  { %v1952_v16 = vpop.f32.mrf.mxu1 }
0x242d   :  { %v1956_v38 = vadd.f32 %v1952_v16, %v1880_v37 }
0x242e   :  { %v2600_v22 = vpop.f32.mrf.mxu1 }
0x242f   :  { %2751 = vtanh.f32 %v1956_v38  ;;  %v2327_v42 = vmul.f32 -1.442695, %v1956_v38 }
0x2431   :  { %2753 = vpow2.f32 %v2327_v42 }
0x243c   :  { %v2752_v39 = vpop.eup %2751 }
0x243d   :  { %1966 = vrot.lane.b32.xlu0 %v2752_v39, %s2893_s3 }
0x243e   :  { %v2754_v43 = vpop.eup %2753 }
0x243f   :  { %v1960_v40 = vadd.f32 1.0, %v2754_v43 }
0x2441   :  { %2755 = vrcp.f32 %v1960_v40 }
0x244e   :  { %v2756_v26 = vpop.eup %2755 }
0x244f   :  { %v1964_v45 = vmul.f32 %v2756_v26, %v1873_v32  ;;  %v2332_v32 = vld [vmem:[%s3315_s8] ss:$0 sm:$0xff] }
0x24af   :  { %v1967_v44 = vpop.permute.xlu0 %1966 }
0x24b0   :  { %v1969_v17 = vmul.f32 %v2756_v26, %v1967_v44 }
0x24b2   :  { %1971 = vrot.lane.b32.xlu1 %v1969_v17, %s2893_s3 }
0x2524   :  { %v1972_v41 = vpop.permute.xlu1 %1971 }
0x2525   :  { %v1974_v46 = vadd.f32 %v1972_v41, %v1964_v45 }
0x2527   :  { %2757 = vtanh.f32 %v1974_v46 }
0x2534   :  { %v2758_v47 = vpop.eup %2757 }
0x2535   :  { %1977 = vrot.lane.b32.xlu0 %v2758_v47, %s2893_s3 }
0x25a7   :  { %v1978_v48 = vpop.permute.xlu0 %1977 }
0x25a8   :  { %v1980_v49 = vmul.f32 %v2756_v26, %v1978_v48 }
0x25aa   :  { %1983 = vrot.lane.b32.xlu1 %v1980_v49, %s2894_s15 }
0x261c   :  { %v1984_v50 = vpop.permute.xlu1 %1983 }
0x261d   :  { %2610 = vmatmul.mubr.msk.f32.vlgmr.msra.gmra.mxu0 %vm344_vm3, %v1984_v50 }
0x261e   :  { %2631 = vmatprep.mubr.msk.f32.mxu0 %vm2892_vm0, %v2890_v3  ;;  %2624 = vmatpush3.msra.mxu0 %v2186_v23 }
0x261f   :  { %2625 = vmatprep.subr.mxu0 %v2890_v3 }
0x2620   :  { %2626 = vmatpush3.msra.mxu0 %v2185_v24 }
0x2621   :  { %2627 = vmatprep.subr.mxu0 %v2890_v3 }
0x2622   :  { %2628 = vmatpush3.msra.mxu0 %v2184_v25 }
0x2623   :  { %2629 = vmatprep.subr.mxu0 %v2890_v3 }
0x2624   :  { %2630 = vmatpush3.msra.mxu0 %v2183_v27 }
0x26dd   :  { %v2053_v52 = vpop.f32.mrf.mxu0 }
0x26de   :  { %v2057_v53 = vadd.f32 %v2053_v52, %v1981_v51 }
0x26df   :  { %v2611_v54 = vpop.f32.mrf.mxu0 }
0x26e0   :  { %2759 = vtanh.f32 %v2057_v53  ;;  %v2329_v56 = vmul.f32 -1.442695, %v2057_v53 }
0x26e2   :  { %2761 = vpow2.f32 %v2329_v56 }
0x26ed   :  { %v2760_v55 = vpop.eup %2759 }
0x26ee   :  { %2067 = vrot.lane.b32.xlu0 %v2760_v55, %s2893_s3 }
0x26ef   :  { %v2762_v57 = vpop.eup %2761 }
0x26f0   :  { %v2061_v58 = vadd.f32 1.0, %v2762_v57 }
0x26f2   :  { %2763 = vrcp.f32 %v2061_v58 }
0x26ff   :  { %v2764_v59 = vpop.eup %2763 }
0x2700   :  { %v2065_v62 = vmul.f32 %v2764_v59, %v1974_v46 }
0x2760   :  { %v2068_v60 = vpop.permute.xlu0 %2067 }
0x2761   :  { %v2070_v61 = vmul.f32 %v2764_v59, %v2068_v60 }
0x2763   :  { %2072 = vrot.lane.b32.xlu1 %v2070_v61, %s2893_s3 }
0x27d5   :  { %v2073_v63 = vpop.permute.xlu1 %2072 }
0x27d6   :  { %v2075_v0 = vadd.f32 %v2073_v63, %v2065_v62 }
0x27d8   :  { %2765 = vtanh.f32 %v2075_v0 }
0x27e5   :  { %v2766_v1 = vpop.eup %2765 }
0x27e6   :  { %2078 = vrot.lane.b32.xlu0 %v2766_v1, %s2893_s3 }
0x2858   :  { %v2079_v2 = vpop.permute.xlu0 %2078 }
0x2859   :  { %v2081_v4 = vmul.f32 %v2764_v59, %v2079_v2 }
0x285b   :  { %2084 = vrot.lane.b32.xlu1 %v2081_v4, %s2894_s15 }
0x28cd   :  { %v2085_v5 = vpop.permute.xlu1 %2084 }
0x28ce   :  { %2621 = vmatmul.mubr.msk.f32.vlgmr.msra.gmra.mxu1 %vm344_vm3, %v2085_v5 }
0x298e   :  { %v2154_v7 = vpop.f32.mrf.mxu1 }
0x298f   :  { %v2158_v9 = vadd.f32 %v2154_v7, %v2082_v6 }
0x2990   :  { %v2622_v10 = vpop.f32.mrf.mxu1 }
0x2991   :  { %2767 = vtanh.f32 %v2158_v9  ;;  %v2331_v12 = vmul.f32 -1.442695, %v2158_v9 }
0x2993   :  { %2769 = vpow2.f32 %v2331_v12 }
0x299e   :  { %v2768_v11 = vpop.eup %2767 }
0x299f   :  { %2168 = vrot.lane.b32.xlu0 %v2768_v11, %s2893_s3 }
0x29a0   :  { %v2770_v8 = vpop.eup %2769 }
0x29a1   :  { %v2162_v13 = vadd.f32 1.0, %v2770_v8 }
0x29a3   :  { %2771 = vrcp.f32 %v2162_v13 }
0x29b0   :  { %v2772_v14 = vpop.eup %2771 }
0x29b1   :  { %v2166_v19 = vmul.f32 %v2772_v14, %v2075_v0 }
0x2a11   :  { %v2169_v15 = vpop.permute.xlu0 %2168 }
0x2a12   :  { %v2171_v18 = vmul.f32 %v2772_v14, %v2169_v15 }
0x2a14   :  { %2173 = vrot.lane.b32.xlu1 %v2171_v18, %s2893_s3 }
0x2a86   :  { %v2174_v20 = vpop.permute.xlu1 %2173 }
0x2a87   :  { %v2176_v21 = vadd.f32 %v2174_v20, %v2166_v19 }
0x2a89   :  { %2773 = vtanh.f32 %v2176_v21 }
0x2a96   :  { %v2774_v28 = vpop.eup %2773 }
0x2a97   :  { %2179 = vrot.lane.b32.xlu0 %v2774_v28, %s2893_s3 }
0x2b09   :  { %v2180_v29 = vpop.permute.xlu0 %2179 }
0x2b0a   :  { %v2182_v30 = vmul.f32 %v2772_v14, %v2180_v29 }
0x2b0c   :  { %2195 = vrot.lane.b32.xlu1 %v2182_v30, %s2894_s15 }
0x2b7e   :  { %v2196_v31 = vpop.permute.xlu1 %2195 }
0x2b7f   :  { %2632 = vmatmul.mubr.msk.f32.vlgmr.msra.gmra.mxu0 %vm344_vm3, %v2196_v31 }
0x2c3f   :  { %v2265_v33 = vpop.f32.mrf.mxu0 }
0x2c40   :  { %v2266_v3 = vadd.f32 %v2332_v32, %v2265_v33 }
0x2c41   :  { %v2633_v34 = vpop.f32.mrf.mxu0 }
0x2c42   :  { %2270 = vst.msk [vmem:[#allocation12] sm:$0x3] %vm2269_vm4, %v2266_v3 }
0x2c43   :  { %2866 = shalt.err (!%p2863_p10)
}
0x2c44   :  { %2280 = dma.vmem_to_hbm [thread:$0]  %s2278_s7, 32, %s3316_s9, [#allocation6]  }
0x2c45   :  { %2881 = dma.done.wait [#allocation6], 32  }
0x2c46   :  { %2882 = vsyncadd [#allocation6], 4294967264 }
0x2c47   :  { %2284 = vsyncpa [#allocation5], 1 }
0x2c48   :  { %2285 = vsyncpa [#allocation8], 1 }
0x2c49   :  { %2286 = vsyncpa [#allocation11], 1 }
0x2c4a   :  { %2287 = vsyncpa [#allocation6], 1 }

</bundles_post_ra>
